<compile_context>
chip_gen: v6e
topology: v6e:2x2x1
jax: 0.10.0
libtpu: 0.0.40
codegen_flags: <defaults>
</compile_context>

<pallas_src>
import functools
import math

import jax
import jax.numpy as jnp
from jax.experimental import pallas as pl
from jax.experimental.pallas import tpu as pltpu

_LN_EPS = 1e-5
_KNN_K = 8  # fixed inside get_graph_feature


# -----------------------------------------------------------------------------
# helpers usable both inside kernels and in the pure-JAX reference
# -----------------------------------------------------------------------------
def _layer_norm(x, gamma, beta):
    mu = jnp.mean(x, axis=-1, keepdims=True)
    var = jnp.mean(jnp.square(x - mu), axis=-1, keepdims=True)
    return (x - mu) * jax.lax.rsqrt(var + _LN_EPS) * gamma + beta


def _gelu_tanh(x):
    # TODO(synk): PyTorch nn.GELU() default is exact erf; tanh approximation is
    # used for robust Mosaic lowering (~1e-3-level deviation on the MLP path).
    c = math.sqrt(2.0 / math.pi)
    return 0.5 * x * (1.0 + jnp.tanh(c * (x + 0.044715 * x * x * x)))


def _leaky_relu(x, slope=0.2):  # module uses nn.LeakyReLU(negative_slope=0.2)
    return jnp.where(x > 0, x, slope * x)


# -----------------------------------------------------------------------------
# Single fused kernel: LN1 + MHA (+ kNN branch) + residual + LN2 + MLP + residual
# One grid step == one batch element.
# -----------------------------------------------------------------------------
def _block_kernel(*refs, num_heads, scale, kk, has_knn):
    if has_knn:
        (x_ref, idx_ref, ln1g, ln1b, wqkv, wo, bo, wknn, bk, wm, bm,
         ln2g, ln2b, w1, b1, w2, b2, out_ref, attn_sc) = refs
    else:
        (x_ref, ln1g, ln1b, wqkv, wo, bo,
         ln2g, ln2b, w1, b1, w2, b2, out_ref, attn_sc) = refs
        idx_ref = wknn = bk = wm = bm = None

    f32 = jnp.float32
    bf16 = jnp.bfloat16

    x = x_ref[0]                                     # (N, C) f32
    n_tok, c_dim = x.shape
    hd = c_dim // num_heads

    # ---- LN1 ----
    nx = _layer_norm(x, ln1g[...], ln1b[...])
    nx_b = nx.astype(bf16)

    # ---- fused QKV projection: one wide, lane-dense MXU matmul ----
    qkv = jnp.dot(nx_b, wqkv[...], preferred_element_type=f32)     # (N, 3C)
    q = qkv[:, :c_dim] * scale                       # fold softmax scale once
    k = qkv[:, c_dim:2 * c_dim]
    v = qkv[:, 2 * c_dim:]

    # ---- per-head attention, heads written straight into lane-dense scratch ----
    for h in range(num_heads):                       # static unroll
        sl = slice(h * hd, (h + 1) * hd)
        qh = q[:, sl].astype(bf16)
        kh = k[:, sl].astype(bf16)
        vh = v[:, sl].astype(bf16)
        logits = jax.lax.dot_general(
            qh, kh, (((1,), (1,)), ((), ())),
            preferred_element_type=f32)              # (N, N)
        logits = logits - jnp.max(logits, axis=-1, keepdims=True)
        p = jnp.exp(logits)
        p = p * pl.reciprocal(jnp.sum(p, axis=-1, keepdims=True), approx=True)
        attn_sc[:, sl] = jnp.dot(p.astype(bf16), vh, preferred_element_type=f32)

    x_attn = (jnp.dot(attn_sc[...].astype(bf16), wo[...],
                      preferred_element_type=f32) + bo[...])

    if has_knn:
        # knn_map(cat(f - nx, nx)) == leaky_relu(f @ Wd + nx @ (Wx - Wd) + b),
        # with the point-wise projection done BEFORE the neighbor gather
        # (gather is linear), removing the k-fold redundant matmul work.
        # Both halves come from one fused (C, 2C) matmul.
        proj = jnp.dot(nx_b, wknn[...], preferred_element_type=f32)  # (N, 2C)
        proj_diff = proj[:, :c_dim]
        base = proj[:, c_dim:] + bk[...]

        # In-kernel gather of proj_diff rows via one-hot(idx) @ proj_diff
        # (MXU gather; indices are batch-local so no HBM round trip).
        idx = idx_ref[0]                                             # (kk*N, 1) i32
        cols = jax.lax.broadcasted_iota(jnp.int32, (kk * n_tok, n_tok), 1)
        onehot = jnp.where(idx == cols, 1.0, 0.0).astype(bf16)       # (kk*N, N)
        gathered = jnp.dot(onehot, proj_diff.astype(bf16),
                           preferred_element_type=f32)               # (kk*N, C)

        knn_f = None
        for j in range(kk):                                          # static, k=8
            hj = _leaky_relu(gathered[j * n_tok:(j + 1) * n_tok, :] + base)
            knn_f = hj if knn_f is None else jnp.maximum(knn_f, hj)

        # merge_map(cat(x_1, knn_f)) as two half matmuls -> no concat relayout
        merged = (jnp.dot(x_attn.astype(bf16), wm[:c_dim, :],
                          preferred_element_type=f32)
                  + jnp.dot(knn_f.astype(bf16), wm[c_dim:, :],
                            preferred_element_type=f32)
                  + bm[...])
        x1 = x + merged
    else:
        x1 = x + x_attn

    # ---- LN2 + MLP + residual ----
    nx2 = _layer_norm(x1, ln2g[...], ln2b[...])
    hid = jnp.dot(nx2.astype(bf16), w1[...], preferred_element_type=f32) + b1[...]
    hid = _gelu_tanh(hid)
    mlp = jnp.dot(hid.astype(bf16), w2[...], preferred_element_type=f32) + b2[...]
    out_ref[0] = (x1 + mlp).astype(out_ref.dtype)


# -----------------------------------------------------------------------------
# Wrapper
# -----------------------------------------------------------------------------
def _vmem_limit_bytes(N, C, H, kk, has_knn):
    f32b, bf16b, i32b = 4, 2, 4
    act = 2 * N * C * f32b                       # x in, out blocks
    scratch = N * C * f32b                       # attention scratch
    weights = bf16b * (3 * C * C + C * C + C * H + H * C)
    if has_knn:
        weights += bf16b * (2 * C * C + 2 * C * C)
        act += kk * N * i32b
        act += kk * N * (N + C) * 4              # onehot + gathered temporaries
    total = 2 * (act + weights) + scratch + (4 << 20)
    return int(min(max(total, 32 << 20), 64 << 20))


@functools.partial(jax.jit, static_argnames=("num_heads",))
def block_forward(x, params, knn_index=None, *, num_heads):
    """x: (B, N, C) f32, knn_index: flat (B*8*N,) int32 or None -> (B, N, C)."""
    B, N, C = x.shape
    H = params["w_fc1"].shape[1]
    dtype = x.dtype
    scale = (C // num_heads) ** -0.5
    kk = _KNN_K
    bf16 = jnp.bfloat16
    has_knn = knn_index is not None

    row = lambda v: v.reshape(1, -1)

    # Weights pre-cast (and pre-fused) to bf16: halves weight DMA/VMEM, feeds
    # the MXU its native operand type (accumulation stays f32 in-kernel).
    wqkv = params["w_qkv"].astype(bf16)                               # (C, 3C)
    wo = params["w_proj"].astype(bf16)                                # (C, C)
    w1 = params["w_fc1"].astype(bf16)                                 # (C, H)
    w2 = params["w_fc2"].astype(bf16)                                 # (H, C)

    per_b = pl.BlockSpec((1, N, C), lambda b: (b, 0, 0))

    def const(shape):
        zeros = (0,) * len(shape)
        return pl.BlockSpec(shape, lambda b: zeros)

    cparams = pltpu.CompilerParams(
        dimension_semantics=("parallel",),
        vmem_limit_bytes=_vmem_limit_bytes(N, C, H, kk, has_knn))

    common_tail_specs = [
        const((1, C)), const((1, C)),            # ln2 gamma/beta
        const((C, H)), const((1, H)),            # fc1
        const((H, C)), const((1, C)),            # fc2
    ]
    common_tail_args = (
        row(params["ln2_g"]), row(params["ln2_b"]),
        w1, row(params["b_fc1"]),
        w2, row(params["b_fc2"]))

    if not has_knn:
        kernel = functools.partial(_block_kernel, num_heads=num_heads,
                                   scale=scale, kk=kk, has_knn=False)
        return pl.pallas_call(
            kernel,
            out_shape=jax.ShapeDtypeStruct((B, N, C), dtype),
            grid=(B,),
            in_specs=[
                per_b,
                const((1, C)), const((1, C)),            # ln1 gamma/beta
                const((C, 3 * C)), const((C, C)), const((1, C)),
            ] + common_tail_specs,
            out_specs=per_b,
            scratch_shapes=[pltpu.VMEM((N, C), jnp.float32)],
            compiler_params=cparams,
        )(x,
          row(params["ln1_g"]), row(params["ln1_b"]),
          wqkv, wo, row(params["b_proj"]),
          *common_tail_args)

    # knn path: fuse knn_map weights into a single (C, 2C) projection:
    #   knn_map(cat(f - nx, nx)) = f @ Wd + nx @ (Wx - Wd) + b
    wknn = jnp.concatenate(
        [params["w_knn"][:C], params["w_knn"][C:] - params["w_knn"][:C]],
        axis=1).astype(bf16)                                          # (C, 2C)
    wm = params["w_merge"].astype(bf16)                               # (2C, C)

    # get_graph_feature's indices are batch-local by construction; convert to
    # per-batch row offsets so the gather can run inside the kernel.
    idx_local = (knn_index.reshape(B, kk * N)
                 - (jnp.arange(B, dtype=jnp.int32) * N)[:, None]
                 ).astype(jnp.int32).reshape(B, kk * N, 1)

    kernel = functools.partial(_block_kernel, num_heads=num_heads,
                               scale=scale, kk=kk, has_knn=True)
    return pl.pallas_call(
        kernel,
        out_shape=jax.ShapeDtypeStruct((B, N, C), dtype),
        grid=(B,),
        in_specs=[
            per_b,
            pl.BlockSpec((1, kk * N, 1), lambda b: (b, 0, 0)),       # idx
            const((1, C)), const((1, C)),                            # ln1
            const((C, 3 * C)), const((C, C)), const((1, C)),         # qkv, proj
            const((C, 2 * C)), const((1, C)),                        # knn_map
            const((2 * C, C)), const((1, C)),                        # merge_map
        ] + common_tail_specs,
        out_specs=per_b,
        scratch_shapes=[pltpu.VMEM((N, C), jnp.float32)],
        compiler_params=cparams,
    )(x, idx_local,
      row(params["ln1_g"]), row(params["ln1_b"]),
      wqkv, wo, row(params["b_proj"]),
      wknn, row(params["b_knn"]),
      wm, row(params["b_merge"]),
      *common_tail_args)


# -----------------------------------------------------------------------------
# Parameter construction (JAX layout: Linear weight is (in, out))
# -----------------------------------------------------------------------------
def make_block_params(key, dim, mlp_ratio=4.0, dtype=jnp.float32):
    hidden = int(dim * mlp_ratio)
    keys = iter(jax.random.split(key, 16))

    def dense(k_, cin, cout, s=0.1):
        return (s * jax.random.normal(k_, (cin, cout), dtype)).astype(dtype)

    def vec(k_, c, s=0.05):
        return (s * jax.random.normal(k_, (c,), dtype)).astype(dtype)

    return {
        "ln1_g": 1.0 + vec(next(keys), dim),
        "ln1_b": vec(next(keys), dim),
        "w_qkv": dense(next(keys), dim, 3 * dim),            # qkv_bias=False
        "w_proj": dense(next(keys), dim, dim),
        "b_proj": vec(next(keys), dim),
        "w_knn": dense(next(keys), 2 * dim, dim),
        "b_knn": vec(next(keys), dim),
        "w_merge": dense(next(keys), 2 * dim, dim),
        "b_merge": vec(next(keys), dim),
        "ln2_g": 1.0 + vec(next(keys), dim),
        "ln2_b": vec(next(keys), dim),
        "w_fc1": dense(next(keys), dim, hidden),
        "b_fc1": vec(next(keys), hidden),
        "w_fc2": dense(next(keys), hidden, dim),
        "b_fc2": vec(next(keys), dim),
    }


# -----------------------------------------------------------------------------
# Pure-JAX reference (mirrors the PyTorch code path literally)
# -----------------------------------------------------------------------------
def block_reference(x, params, knn_index=None, *, num_heads):
    B, N, C = x.shape
    hd = C // num_heads
    scale = hd ** -0.5

    nx = _layer_norm(x, params["ln1_g"], params["ln1_b"])
    qkv = (nx @ params["w_qkv"]).reshape(B, N, 3, num_heads, hd)
    qkv = jnp.transpose(qkv, (2, 0, 3, 1, 4))
    q, k, v = qkv[0], qkv[1], qkv[2]
    attn = jnp.einsum("bhnd,bhmd->bhnm", q, k) * scale
    attn = jax.nn.softmax(attn, axis=-1)
    y = jnp.einsum("bhnm,bhmd->bhnd", attn, v)
    y = jnp.transpose(y, (0, 2, 1, 3)).reshape(B, N, C)
    x_1 = y @ params["w_proj"] + params["b_proj"]

    if knn_index is not None:
        kk = _KNN_K
        feature = nx.reshape(B * N, C)[knn_index].reshape(B, kk, N, C)
        xq = jnp.broadcast_to(nx[:, None, :, :], (B, kk, N, C))
        gf = jnp.concatenate([feature - xq, xq], axis=-1)
        knn_f = _leaky_relu(gf @ params["w_knn"] + params["b_knn"])
        knn_f = knn_f.max(axis=1)
        x_1 = (jnp.concatenate([x_1, knn_f], axis=-1) @ params["w_merge"]
               + params["b_merge"])

    x = x + x_1
    nx2 = _layer_norm(x, params["ln2_g"], params["ln2_b"])
    h = _gelu_tanh(nx2 @ params["w_fc1"] + params["b_fc1"])
    return x + (h @ params["w_fc2"] + params["b_fc2"])


if __name__ == "__main__":
    B, N, dim, num_heads = 2, 16, 32, 4

    key = jax.random.PRNGKey(0)
    kx, kp, kn = jax.random.split(key, 3)
    x = jax.random.normal(kx, (B, N, dim), jnp.float32)
    params = make_block_params(kp, dim)

    # kNN indices (within each batch element), flattened into the B*N axis
    # exactly like the PyTorch `knn_index` tensor.
    nbrs = jax.random.randint(kn, (B, _KNN_K, N), 0, N)
    knn_index = (nbrs + jnp.arange(B)[:, None, None] * N).reshape(-1).astype(jnp.int32)

    out = jax.block_until_ready(block_forward(x, params, knn_index, num_heads=num_heads))
    out2 = jax.block_until_ready(block_forward(x, params, None, num_heads=num_heads))

    # f32 gold reference (kernel uses bf16 MXU operands -> looser tolerance).
    with jax.default_matmul_precision("highest"):
        ref = block_reference(x, params, knn_index, num_heads=num_heads)
        ref2 = block_reference(x, params, None, num_heads=num_heads)

    assert out.shape == (B, N, dim), out.shape
    assert jnp.allclose(out, ref, atol=5e-2, rtol=5e-2), float(jnp.max(jnp.abs(out - ref)))
    assert jnp.allclose(out2, ref2, atol=5e-2, rtol=5e-2), float(jnp.max(jnp.abs(out2 - ref2)))

    print("KERNEL_OK")
</pallas_src>

<mosaic_0001>
module attributes {stable_mosaic.version = 11 : i64} {
  func.func @_block_kernel(%arg0: i32, %arg1: memref<1x16x32xf32, #tpu.memory_space<vmem>>, %arg2: memref<1x128x1xi32, #tpu.memory_space<vmem>>, %arg3: memref<1x32xf32, #tpu.memory_space<vmem>>, %arg4: memref<1x32xf32, #tpu.memory_space<vmem>>, %arg5: memref<32x96xbf16, #tpu.memory_space<vmem>>, %arg6: memref<32x32xbf16, #tpu.memory_space<vmem>>, %arg7: memref<1x32xf32, #tpu.memory_space<vmem>>, %arg8: memref<32x64xbf16, #tpu.memory_space<vmem>>, %arg9: memref<1x32xf32, #tpu.memory_space<vmem>>, %arg10: memref<64x32xbf16, #tpu.memory_space<vmem>>, %arg11: memref<1x32xf32, #tpu.memory_space<vmem>>, %arg12: memref<1x32xf32, #tpu.memory_space<vmem>>, %arg13: memref<1x32xf32, #tpu.memory_space<vmem>>, %arg14: memref<32x128xbf16, #tpu.memory_space<vmem>>, %arg15: memref<1x128xf32, #tpu.memory_space<vmem>>, %arg16: memref<128x32xbf16, #tpu.memory_space<vmem>>, %arg17: memref<1x32xf32, #tpu.memory_space<vmem>>, %arg18: memref<1x16x32xf32, #tpu.memory_space<vmem>>, %arg19: memref<16x32xf32, #tpu.memory_space<vmem>>) attributes {dimension_semantics = [#tpu.dimension_semantics<parallel>], iteration_bounds = array<i64: 2>, scalar_prefetch = 0 : i64, scratch_operands = 1 : i64, tpu.core_type = #tpu.core_type<tc>, window_params = [{transform_indices = @transform_0, window_bounds = array<i64: 1, 16, 32>}, {transform_indices = @transform_1, window_bounds = array<i64: 1, 128, 1>}, {pipeline_mode = #tpu.pipeline_mode<synchronous>, transform_indices = @transform_2, window_bounds = array<i64: 1, 32>}, {pipeline_mode = #tpu.pipeline_mode<synchronous>, transform_indices = @transform_3, window_bounds = array<i64: 1, 32>}, {pipeline_mode = #tpu.pipeline_mode<synchronous>, transform_indices = @transform_4, window_bounds = array<i64: 32, 96>}, {pipeline_mode = #tpu.pipeline_mode<synchronous>, transform_indices = @transform_5, window_bounds = array<i64: 32, 32>}, {pipeline_mode = #tpu.pipeline_mode<synchronous>, transform_indices = @transform_6, window_bounds = array<i64: 1, 32>}, {pipeline_mode = #tpu.pipeline_mode<synchronous>, transform_indices = @transform_7, window_bounds = array<i64: 32, 64>}, {pipeline_mode = #tpu.pipeline_mode<synchronous>, transform_indices = @transform_8, window_bounds = array<i64: 1, 32>}, {pipeline_mode = #tpu.pipeline_mode<synchronous>, transform_indices = @transform_9, window_bounds = array<i64: 64, 32>}, {pipeline_mode = #tpu.pipeline_mode<synchronous>, transform_indices = @transform_10, window_bounds = array<i64: 1, 32>}, {pipeline_mode = #tpu.pipeline_mode<synchronous>, transform_indices = @transform_11, window_bounds = array<i64: 1, 32>}, {pipeline_mode = #tpu.pipeline_mode<synchronous>, transform_indices = @transform_12, window_bounds = array<i64: 1, 32>}, {pipeline_mode = #tpu.pipeline_mode<synchronous>, transform_indices = @transform_13, window_bounds = array<i64: 32, 128>}, {pipeline_mode = #tpu.pipeline_mode<synchronous>, transform_indices = @transform_14, window_bounds = array<i64: 1, 128>}, {pipeline_mode = #tpu.pipeline_mode<synchronous>, transform_indices = @transform_15, window_bounds = array<i64: 128, 32>}, {pipeline_mode = #tpu.pipeline_mode<synchronous>, transform_indices = @transform_16, window_bounds = array<i64: 1, 32>}, {transform_indices = @transform_17, window_bounds = array<i64: 1, 16, 32>}]} {
    %c0 = arith.constant 0 : index
    %c0_0 = arith.constant 0 : index
    %c0_1 = arith.constant 0 : index
    %0 = vector.load %arg1[%c0, %c0_0, %c0_1] : memref<1x16x32xf32, #tpu.memory_space<vmem>>, vector<1x16x32xf32>
    %1 = vector.shape_cast %0 : vector<1x16x32xf32> to vector<16x32xf32>
    %c0_2 = arith.constant 0 : index
    %c0_3 = arith.constant 0 : index
    %2 = vector.load %arg3[%c0_2, %c0_3] : memref<1x32xf32, #tpu.memory_space<vmem>>, vector<1x32xf32>
    %c0_4 = arith.constant 0 : index
    %c0_5 = arith.constant 0 : index
    %3 = vector.load %arg4[%c0_4, %c0_5] : memref<1x32xf32, #tpu.memory_space<vmem>>, vector<1x32xf32>
    %cst = arith.constant dense<0.000000e+00> : vector<16xf32>
    %4 = vector.multi_reduction <add>, %1, %cst [1] : vector<16x32xf32> to vector<16xf32>
    %5 = vector.shape_cast %4 : vector<16xf32> to vector<16x1xf32>
    %cst_6 = arith.constant 3.200000e+01 : f32
    %6 = vector.broadcast %cst_6 : f32 to vector<16x1xf32>
    %7 = arith.divf %5, %6 : vector<16x1xf32>
    %8 = vector.broadcast %7 : vector<16x1xf32> to vector<16x32xf32>
    %9 = arith.subf %1, %8 : vector<16x32xf32>
    %10 = arith.mulf %9, %9 : vector<16x32xf32>
    %cst_7 = arith.constant dense<0.000000e+00> : vector<16xf32>
    %11 = vector.multi_reduction <add>, %10, %cst_7 [1] : vector<16x32xf32> to vector<16xf32>
    %12 = vector.shape_cast %11 : vector<16xf32> to vector<16x1xf32>
    %cst_8 = arith.constant 3.200000e+01 : f32
    %13 = vector.broadcast %cst_8 : f32 to vector<16x1xf32>
    %14 = arith.divf %12, %13 : vector<16x1xf32>
    %15 = vector.broadcast %7 : vector<16x1xf32> to vector<16x32xf32>
    %16 = arith.subf %1, %15 : vector<16x32xf32>
    %cst_9 = arith.constant 9.99999974E-6 : f32
    %17 = vector.broadcast %cst_9 : f32 to vector<16x1xf32>
    %18 = arith.addf %14, %17 : vector<16x1xf32>
    %19 = math.rsqrt %18 : vector<16x1xf32>
    %20 = vector.broadcast %19 : vector<16x1xf32> to vector<16x32xf32>
    %21 = arith.mulf %16, %20 : vector<16x32xf32>
    %22 = vector.broadcast %2 : vector<1x32xf32> to vector<16x32xf32>
    %23 = arith.mulf %21, %22 : vector<16x32xf32>
    %24 = vector.broadcast %3 : vector<1x32xf32> to vector<16x32xf32>
    %25 = arith.addf %23, %24 : vector<16x32xf32>
    %26 = arith.truncf %25 : vector<16x32xf32> to vector<16x32xbf16>
    %c0_10 = arith.constant 0 : index
    %c0_11 = arith.constant 0 : index
    %27 = vector.load %arg5[%c0_10, %c0_11] : memref<32x96xbf16, #tpu.memory_space<vmem>>, vector<32x96xbf16>
    %cst_12 = arith.constant dense<0.000000e+00> : vector<16x96xf32>
    %28 = tpu.matmul %26, %27, %cst_12 {dimension_numbers = #tpu.dot_dimension_numbers<[1], [0], [0], [1], [0, 0, 1, 1], [], []>} : vector<16x32xbf16>, vector<32x96xbf16>, vector<16x96xf32> -> vector<16x96xf32>
    %29 = vector.extract_strided_slice %28 {offsets = [0, 0], sizes = [16, 32], strides = [1, 1]} : vector<16x96xf32> to vector<16x32xf32>
    %cst_13 = arith.constant 0.353553385 : f32
    %30 = vector.broadcast %cst_13 : f32 to vector<16x32xf32>
    %31 = arith.mulf %29, %30 : vector<16x32xf32>
    %32 = vector.extract_strided_slice %28 {offsets = [0, 32], sizes = [16, 32], strides = [1, 1]} : vector<16x96xf32> to vector<16x32xf32>
    %33 = vector.extract_strided_slice %28 {offsets = [0, 64], sizes = [16, 32], strides = [1, 1]} : vector<16x96xf32> to vector<16x32xf32>
    %34 = vector.extract_strided_slice %31 {offsets = [0, 0], sizes = [16, 8], strides = [1, 1]} : vector<16x32xf32> to vector<16x8xf32>
    %35 = arith.truncf %34 : vector<16x8xf32> to vector<16x8xbf16>
    %36 = vector.extract_strided_slice %32 {offsets = [0, 0], sizes = [16, 8], strides = [1, 1]} : vector<16x32xf32> to vector<16x8xf32>
    %37 = arith.truncf %36 : vector<16x8xf32> to vector<16x8xbf16>
    %38 = vector.extract_strided_slice %33 {offsets = [0, 0], sizes = [16, 8], strides = [1, 1]} : vector<16x32xf32> to vector<16x8xf32>
    %39 = arith.truncf %38 : vector<16x8xf32> to vector<16x8xbf16>
    %cst_14 = arith.constant dense<0.000000e+00> : vector<16x16xf32>
    %40 = tpu.matmul %35, %37, %cst_14 {dimension_numbers = #tpu.dot_dimension_numbers<[1], [1], [0], [0], [0, 0, 1, 0], [], []>} : vector<16x8xbf16>, vector<16x8xbf16>, vector<16x16xf32> -> vector<16x16xf32>
    %cst_15 = arith.constant dense<0xFF800000> : vector<16xf32>
    %41 = vector.multi_reduction <maximumf>, %40, %cst_15 [1] : vector<16x16xf32> to vector<16xf32>
    %42 = vector.shape_cast %41 : vector<16xf32> to vector<16x1xf32>
    %43 = vector.broadcast %42 : vector<16x1xf32> to vector<16x16xf32>
    %44 = arith.subf %40, %43 : vector<16x16xf32>
    %45 = math.exp %44 : vector<16x16xf32>
    %cst_16 = arith.constant dense<0.000000e+00> : vector<16xf32>
    %46 = vector.multi_reduction <add>, %45, %cst_16 [1] : vector<16x16xf32> to vector<16xf32>
    %47 = vector.shape_cast %46 : vector<16xf32> to vector<16x1xf32>
    %48 = tpu.reciprocal %47 {approx = true} : vector<16x1xf32> -> vector<16x1xf32>
    %49 = vector.broadcast %48 : vector<16x1xf32> to vector<16x16xf32>
    %50 = arith.mulf %45, %49 : vector<16x16xf32>
    %51 = arith.truncf %50 : vector<16x16xf32> to vector<16x16xbf16>
    %cst_17 = arith.constant dense<0.000000e+00> : vector<16x8xf32>
    %52 = tpu.matmul %51, %39, %cst_17 {dimension_numbers = #tpu.dot_dimension_numbers<[1], [0], [0], [1], [0, 0, 1, 1], [], []>} : vector<16x16xbf16>, vector<16x8xbf16>, vector<16x8xf32> -> vector<16x8xf32>
    %c0_18 = arith.constant 0 : index
    %c0_19 = arith.constant 0 : index
    %53 = vector.load %arg19[%c0_18, %c0_19] : memref<16x32xf32, #tpu.memory_space<vmem>>, vector<16x8xf32>
    tpu.vector_store %arg19[%c0_18, %c0_19], %52 {strides = array<i32>} : memref<16x32xf32, #tpu.memory_space<vmem>>, vector<16x8xf32>,
    %54 = vector.extract_strided_slice %31 {offsets = [0, 8], sizes = [16, 8], strides = [1, 1]} : vector<16x32xf32> to vector<16x8xf32>
    %55 = arith.truncf %54 : vector<16x8xf32> to vector<16x8xbf16>
    %56 = vector.extract_strided_slice %32 {offsets = [0, 8], sizes = [16, 8], strides = [1, 1]} : vector<16x32xf32> to vector<16x8xf32>
    %57 = arith.truncf %56 : vector<16x8xf32> to vector<16x8xbf16>
    %58 = vector.extract_strided_slice %33 {offsets = [0, 8], sizes = [16, 8], strides = [1, 1]} : vector<16x32xf32> to vector<16x8xf32>
    %59 = arith.truncf %58 : vector<16x8xf32> to vector<16x8xbf16>
    %cst_20 = arith.constant dense<0.000000e+00> : vector<16x16xf32>
    %60 = tpu.matmul %55, %57, %cst_20 {dimension_numbers = #tpu.dot_dimension_numbers<[1], [1], [0], [0], [0, 0, 1, 0], [], []>} : vector<16x8xbf16>, vector<16x8xbf16>, vector<16x16xf32> -> vector<16x16xf32>
    %cst_21 = arith.constant dense<0xFF800000> : vector<16xf32>
    %61 = vector.multi_reduction <maximumf>, %60, %cst_21 [1] : vector<16x16xf32> to vector<16xf32>
    %62 = vector.shape_cast %61 : vector<16xf32> to vector<16x1xf32>
    %63 = vector.broadcast %62 : vector<16x1xf32> to vector<16x16xf32>
    %64 = arith.subf %60, %63 : vector<16x16xf32>
    %65 = math.exp %64 : vector<16x16xf32>
    %cst_22 = arith.constant dense<0.000000e+00> : vector<16xf32>
    %66 = vector.multi_reduction <add>, %65, %cst_22 [1] : vector<16x16xf32> to vector<16xf32>
    %67 = vector.shape_cast %66 : vector<16xf32> to vector<16x1xf32>
    %68 = tpu.reciprocal %67 {approx = true} : vector<16x1xf32> -> vector<16x1xf32>
    %69 = vector.broadcast %68 : vector<16x1xf32> to vector<16x16xf32>
    %70 = arith.mulf %65, %69 : vector<16x16xf32>
    %71 = arith.truncf %70 : vector<16x16xf32> to vector<16x16xbf16>
    %cst_23 = arith.constant dense<0.000000e+00> : vector<16x8xf32>
    %72 = tpu.matmul %71, %59, %cst_23 {dimension_numbers = #tpu.dot_dimension_numbers<[1], [0], [0], [1], [0, 0, 1, 1], [], []>} : vector<16x16xbf16>, vector<16x8xbf16>, vector<16x8xf32> -> vector<16x8xf32>
    %c0_24 = arith.constant 0 : index
    %c8 = arith.constant 8 : index
    %73 = vector.load %arg19[%c0_24, %c8] : memref<16x32xf32, #tpu.memory_space<vmem>>, vector<16x8xf32>
    tpu.vector_store %arg19[%c0_24, %c8], %72 {strides = array<i32>} : memref<16x32xf32, #tpu.memory_space<vmem>>, vector<16x8xf32>,
    %74 = vector.extract_strided_slice %31 {offsets = [0, 16], sizes = [16, 8], strides = [1, 1]} : vector<16x32xf32> to vector<16x8xf32>
    %75 = arith.truncf %74 : vector<16x8xf32> to vector<16x8xbf16>
    %76 = vector.extract_strided_slice %32 {offsets = [0, 16], sizes = [16, 8], strides = [1, 1]} : vector<16x32xf32> to vector<16x8xf32>
    %77 = arith.truncf %76 : vector<16x8xf32> to vector<16x8xbf16>
    %78 = vector.extract_strided_slice %33 {offsets = [0, 16], sizes = [16, 8], strides = [1, 1]} : vector<16x32xf32> to vector<16x8xf32>
    %79 = arith.truncf %78 : vector<16x8xf32> to vector<16x8xbf16>
    %cst_25 = arith.constant dense<0.000000e+00> : vector<16x16xf32>
    %80 = tpu.matmul %75, %77, %cst_25 {dimension_numbers = #tpu.dot_dimension_numbers<[1], [1], [0], [0], [0, 0, 1, 0], [], []>} : vector<16x8xbf16>, vector<16x8xbf16>, vector<16x16xf32> -> vector<16x16xf32>
    %cst_26 = arith.constant dense<0xFF800000> : vector<16xf32>
    %81 = vector.multi_reduction <maximumf>, %80, %cst_26 [1] : vector<16x16xf32> to vector<16xf32>
    %82 = vector.shape_cast %81 : vector<16xf32> to vector<16x1xf32>
    %83 = vector.broadcast %82 : vector<16x1xf32> to vector<16x16xf32>
    %84 = arith.subf %80, %83 : vector<16x16xf32>
    %85 = math.exp %84 : vector<16x16xf32>
    %cst_27 = arith.constant dense<0.000000e+00> : vector<16xf32>
    %86 = vector.multi_reduction <add>, %85, %cst_27 [1] : vector<16x16xf32> to vector<16xf32>
    %87 = vector.shape_cast %86 : vector<16xf32> to vector<16x1xf32>
    %88 = tpu.reciprocal %87 {approx = true} : vector<16x1xf32> -> vector<16x1xf32>
    %89 = vector.broadcast %88 : vector<16x1xf32> to vector<16x16xf32>
    %90 = arith.mulf %85, %89 : vector<16x16xf32>
    %91 = arith.truncf %90 : vector<16x16xf32> to vector<16x16xbf16>
    %cst_28 = arith.constant dense<0.000000e+00> : vector<16x8xf32>
    %92 = tpu.matmul %91, %79, %cst_28 {dimension_numbers = #tpu.dot_dimension_numbers<[1], [0], [0], [1], [0, 0, 1, 1], [], []>} : vector<16x16xbf16>, vector<16x8xbf16>, vector<16x8xf32> -> vector<16x8xf32>
    %c0_29 = arith.constant 0 : index
    %c16 = arith.constant 16 : index
    %93 = vector.load %arg19[%c0_29, %c16] : memref<16x32xf32, #tpu.memory_space<vmem>>, vector<16x8xf32>
    tpu.vector_store %arg19[%c0_29, %c16], %92 {strides = array<i32>} : memref<16x32xf32, #tpu.memory_space<vmem>>, vector<16x8xf32>,
    %94 = vector.extract_strided_slice %31 {offsets = [0, 24], sizes = [16, 8], strides = [1, 1]} : vector<16x32xf32> to vector<16x8xf32>
    %95 = arith.truncf %94 : vector<16x8xf32> to vector<16x8xbf16>
    %96 = vector.extract_strided_slice %32 {offsets = [0, 24], sizes = [16, 8], strides = [1, 1]} : vector<16x32xf32> to vector<16x8xf32>
    %97 = arith.truncf %96 : vector<16x8xf32> to vector<16x8xbf16>
    %98 = vector.extract_strided_slice %33 {offsets = [0, 24], sizes = [16, 8], strides = [1, 1]} : vector<16x32xf32> to vector<16x8xf32>
    %99 = arith.truncf %98 : vector<16x8xf32> to vector<16x8xbf16>
    %cst_30 = arith.constant dense<0.000000e+00> : vector<16x16xf32>
    %100 = tpu.matmul %95, %97, %cst_30 {dimension_numbers = #tpu.dot_dimension_numbers<[1], [1], [0], [0], [0, 0, 1, 0], [], []>} : vector<16x8xbf16>, vector<16x8xbf16>, vector<16x16xf32> -> vector<16x16xf32>
    %cst_31 = arith.constant dense<0xFF800000> : vector<16xf32>
    %101 = vector.multi_reduction <maximumf>, %100, %cst_31 [1] : vector<16x16xf32> to vector<16xf32>
    %102 = vector.shape_cast %101 : vector<16xf32> to vector<16x1xf32>
    %103 = vector.broadcast %102 : vector<16x1xf32> to vector<16x16xf32>
    %104 = arith.subf %100, %103 : vector<16x16xf32>
    %105 = math.exp %104 : vector<16x16xf32>
    %cst_32 = arith.constant dense<0.000000e+00> : vector<16xf32>
    %106 = vector.multi_reduction <add>, %105, %cst_32 [1] : vector<16x16xf32> to vector<16xf32>
    %107 = vector.shape_cast %106 : vector<16xf32> to vector<16x1xf32>
    %108 = tpu.reciprocal %107 {approx = true} : vector<16x1xf32> -> vector<16x1xf32>
    %109 = vector.broadcast %108 : vector<16x1xf32> to vector<16x16xf32>
    %110 = arith.mulf %105, %109 : vector<16x16xf32>
    %111 = arith.truncf %110 : vector<16x16xf32> to vector<16x16xbf16>
    %cst_33 = arith.constant dense<0.000000e+00> : vector<16x8xf32>
    %112 = tpu.matmul %111, %99, %cst_33 {dimension_numbers = #tpu.dot_dimension_numbers<[1], [0], [0], [1], [0, 0, 1, 1], [], []>} : vector<16x16xbf16>, vector<16x8xbf16>, vector<16x8xf32> -> vector<16x8xf32>
    %c0_34 = arith.constant 0 : index
    %c24 = arith.constant 24 : index
    %113 = vector.load %arg19[%c0_34, %c24] : memref<16x32xf32, #tpu.memory_space<vmem>>, vector<16x8xf32>
    tpu.vector_store %arg19[%c0_34, %c24], %112 {strides = array<i32>} : memref<16x32xf32, #tpu.memory_space<vmem>>, vector<16x8xf32>,
    %c0_35 = arith.constant 0 : index
    %c0_36 = arith.constant 0 : index
    %114 = vector.load %arg19[%c0_35, %c0_36] : memref<16x32xf32, #tpu.memory_space<vmem>>, vector<16x32xf32>
    %115 = arith.truncf %114 : vector<16x32xf32> to vector<16x32xbf16>
    %c0_37 = arith.constant 0 : index
    %c0_38 = arith.constant 0 : index
    %116 = vector.load %arg6[%c0_37, %c0_38] : memref<32x32xbf16, #tpu.memory_space<vmem>>, vector<32x32xbf16>
    %cst_39 = arith.constant dense<0.000000e+00> : vector<16x32xf32>
    %117 = tpu.matmul %115, %116, %cst_39 {dimension_numbers = #tpu.dot_dimension_numbers<[1], [0], [0], [1], [0, 0, 1, 1], [], []>} : vector<16x32xbf16>, vector<32x32xbf16>, vector<16x32xf32> -> vector<16x32xf32>
    %c0_40 = arith.constant 0 : index
    %c0_41 = arith.constant 0 : index
    %118 = vector.load %arg7[%c0_40, %c0_41] : memref<1x32xf32, #tpu.memory_space<vmem>>, vector<1x32xf32>
    %119 = vector.broadcast %118 : vector<1x32xf32> to vector<16x32xf32>
    %120 = arith.addf %117, %119 : vector<16x32xf32>
    %c0_42 = arith.constant 0 : index
    %c0_43 = arith.constant 0 : index
    %121 = vector.load %arg8[%c0_42, %c0_43] : memref<32x64xbf16, #tpu.memory_space<vmem>>, vector<32x64xbf16>
    %cst_44 = arith.constant dense<0.000000e+00> : vector<16x64xf32>
    %122 = tpu.matmul %26, %121, %cst_44 {dimension_numbers = #tpu.dot_dimension_numbers<[1], [0], [0], [1], [0, 0, 1, 1], [], []>} : vector<16x32xbf16>, vector<32x64xbf16>, vector<16x64xf32> -> vector<16x64xf32>
    %123 = vector.extract_strided_slice %122 {offsets = [0, 0], sizes = [16, 32], strides = [1, 1]} : vector<16x64xf32> to vector<16x32xf32>
    %124 = vector.extract_strided_slice %122 {offsets = [0, 32], sizes = [16, 32], strides = [1, 1]} : vector<16x64xf32> to vector<16x32xf32>
    %c0_45 = arith.constant 0 : index
    %c0_46 = arith.constant 0 : index
    %125 = vector.load %arg9[%c0_45, %c0_46] : memref<1x32xf32, #tpu.memory_space<vmem>>, vector<1x32xf32>
    %126 = vector.broadcast %125 : vector<1x32xf32> to vector<16x32xf32>
    %127 = arith.addf %124, %126 : vector<16x32xf32>
    %c0_47 = arith.constant 0 : index
    %c0_48 = arith.constant 0 : index
    %c0_49 = arith.constant 0 : index
    %128 = vector.load %arg2[%c0_47, %c0_48, %c0_49] : memref<1x128x1xi32, #tpu.memory_space<vmem>>, vector<1x128x1xi32>
    %129 = vector.shape_cast %128 : vector<1x128x1xi32> to vector<128x1xi32>
    %130 = tpu.iota {dimensions = array<i32: 1>} : vector<128x16xi32>
    %131 = vector.broadcast %129 : vector<128x1xi32> to vector<128x16xi32>
    %132 = arith.cmpi eq, %131, %130 : vector<128x16xi32>
    %cst_50 = arith.constant 1.000000e+00 : f32
    %cst_51 = arith.constant 0.000000e+00 : f32
    %133 = vector.broadcast %cst_50 : f32 to vector<128x16xf32>
    %134 = vector.broadcast %cst_51 : f32 to vector<128x16xf32>
    %135 = arith.select %132, %133, %134 : vector<128x16xi1>, vector<128x16xf32>
    %136 = arith.truncf %135 : vector<128x16xf32> to vector<128x16xbf16>
    %137 = arith.truncf %123 : vector<16x32xf32> to vector<16x32xbf16>
    %cst_52 = arith.constant dense<0.000000e+00> : vector<128x32xf32>
    %138 = tpu.matmul %136, %137, %cst_52 {dimension_numbers = #tpu.dot_dimension_numbers<[1], [0], [0], [1], [0, 0, 1, 1], [], []>} : vector<128x16xbf16>, vector<16x32xbf16>, vector<128x32xf32> -> vector<128x32xf32>
    %139 = vector.extract_strided_slice %138 {offsets = [0, 0], sizes = [16, 32], strides = [1, 1]} : vector<128x32xf32> to vector<16x32xf32>
    %140 = arith.addf %139, %127 : vector<16x32xf32>
    %cst_53 = arith.constant 0.000000e+00 : f32
    %141 = vector.broadcast %cst_53 : f32 to vector<16x32xf32>
    %142 = arith.cmpf ogt, %140, %141 : vector<16x32xf32>
    %cst_54 = arith.constant 2.000000e-01 : f32
    %143 = vector.broadcast %cst_54 : f32 to vector<16x32xf32>
    %144 = arith.mulf %143, %140 : vector<16x32xf32>
    %145 = arith.select %142, %140, %144 : vector<16x32xi1>, vector<16x32xf32>
    %146 = vector.extract_strided_slice %138 {offsets = [16, 0], sizes = [16, 32], strides = [1, 1]} : vector<128x32xf32> to vector<16x32xf32>
    %147 = arith.addf %146, %127 : vector<16x32xf32>
    %cst_55 = arith.constant 0.000000e+00 : f32
    %148 = vector.broadcast %cst_55 : f32 to vector<16x32xf32>
    %149 = arith.cmpf ogt, %147, %148 : vector<16x32xf32>
    %cst_56 = arith.constant 2.000000e-01 : f32
    %150 = vector.broadcast %cst_56 : f32 to vector<16x32xf32>
    %151 = arith.mulf %150, %147 : vector<16x32xf32>
    %152 = arith.select %149, %147, %151 : vector<16x32xi1>, vector<16x32xf32>
    %153 = arith.maximumf %145, %152 : vector<16x32xf32>
    %154 = vector.extract_strided_slice %138 {offsets = [32, 0], sizes = [16, 32], strides = [1, 1]} : vector<128x32xf32> to vector<16x32xf32>
    %155 = arith.addf %154, %127 : vector<16x32xf32>
    %cst_57 = arith.constant 0.000000e+00 : f32
    %156 = vector.broadcast %cst_57 : f32 to vector<16x32xf32>
    %157 = arith.cmpf ogt, %155, %156 : vector<16x32xf32>
    %cst_58 = arith.constant 2.000000e-01 : f32
    %158 = vector.broadcast %cst_58 : f32 to vector<16x32xf32>
    %159 = arith.mulf %158, %155 : vector<16x32xf32>
    %160 = arith.select %157, %155, %159 : vector<16x32xi1>, vector<16x32xf32>
    %161 = arith.maximumf %153, %160 : vector<16x32xf32>
    %162 = vector.extract_strided_slice %138 {offsets = [48, 0], sizes = [16, 32], strides = [1, 1]} : vector<128x32xf32> to vector<16x32xf32>
    %163 = arith.addf %162, %127 : vector<16x32xf32>
    %cst_59 = arith.constant 0.000000e+00 : f32
    %164 = vector.broadcast %cst_59 : f32 to vector<16x32xf32>
    %165 = arith.cmpf ogt, %163, %164 : vector<16x32xf32>
    %cst_60 = arith.constant 2.000000e-01 : f32
    %166 = vector.broadcast %cst_60 : f32 to vector<16x32xf32>
    %167 = arith.mulf %166, %163 : vector<16x32xf32>
    %168 = arith.select %165, %163, %167 : vector<16x32xi1>, vector<16x32xf32>
    %169 = arith.maximumf %161, %168 : vector<16x32xf32>
    %170 = vector.extract_strided_slice %138 {offsets = [64, 0], sizes = [16, 32], strides = [1, 1]} : vector<128x32xf32> to vector<16x32xf32>
    %171 = arith.addf %170, %127 : vector<16x32xf32>
    %cst_61 = arith.constant 0.000000e+00 : f32
    %172 = vector.broadcast %cst_61 : f32 to vector<16x32xf32>
    %173 = arith.cmpf ogt, %171, %172 : vector<16x32xf32>
    %cst_62 = arith.constant 2.000000e-01 : f32
    %174 = vector.broadcast %cst_62 : f32 to vector<16x32xf32>
    %175 = arith.mulf %174, %171 : vector<16x32xf32>
    %176 = arith.select %173, %171, %175 : vector<16x32xi1>, vector<16x32xf32>
    %177 = arith.maximumf %169, %176 : vector<16x32xf32>
    %178 = vector.extract_strided_slice %138 {offsets = [80, 0], sizes = [16, 32], strides = [1, 1]} : vector<128x32xf32> to vector<16x32xf32>
    %179 = arith.addf %178, %127 : vector<16x32xf32>
    %cst_63 = arith.constant 0.000000e+00 : f32
    %180 = vector.broadcast %cst_63 : f32 to vector<16x32xf32>
    %181 = arith.cmpf ogt, %179, %180 : vector<16x32xf32>
    %cst_64 = arith.constant 2.000000e-01 : f32
    %182 = vector.broadcast %cst_64 : f32 to vector<16x32xf32>
    %183 = arith.mulf %182, %179 : vector<16x32xf32>
    %184 = arith.select %181, %179, %183 : vector<16x32xi1>, vector<16x32xf32>
    %185 = arith.maximumf %177, %184 : vector<16x32xf32>
    %186 = vector.extract_strided_slice %138 {offsets = [96, 0], sizes = [16, 32], strides = [1, 1]} : vector<128x32xf32> to vector<16x32xf32>
    %187 = arith.addf %186, %127 : vector<16x32xf32>
    %cst_65 = arith.constant 0.000000e+00 : f32
    %188 = vector.broadcast %cst_65 : f32 to vector<16x32xf32>
    %189 = arith.cmpf ogt, %187, %188 : vector<16x32xf32>
    %cst_66 = arith.constant 2.000000e-01 : f32
    %190 = vector.broadcast %cst_66 : f32 to vector<16x32xf32>
    %191 = arith.mulf %190, %187 : vector<16x32xf32>
    %192 = arith.select %189, %187, %191 : vector<16x32xi1>, vector<16x32xf32>
    %193 = arith.maximumf %185, %192 : vector<16x32xf32>
    %194 = vector.extract_strided_slice %138 {offsets = [112, 0], sizes = [16, 32], strides = [1, 1]} : vector<128x32xf32> to vector<16x32xf32>
    %195 = arith.addf %194, %127 : vector<16x32xf32>
    %cst_67 = arith.constant 0.000000e+00 : f32
    %196 = vector.broadcast %cst_67 : f32 to vector<16x32xf32>
    %197 = arith.cmpf ogt, %195, %196 : vector<16x32xf32>
    %cst_68 = arith.constant 2.000000e-01 : f32
    %198 = vector.broadcast %cst_68 : f32 to vector<16x32xf32>
    %199 = arith.mulf %198, %195 : vector<16x32xf32>
    %200 = arith.select %197, %195, %199 : vector<16x32xi1>, vector<16x32xf32>
    %201 = arith.maximumf %193, %200 : vector<16x32xf32>
    %202 = arith.truncf %120 : vector<16x32xf32> to vector<16x32xbf16>
    %c0_69 = arith.constant 0 : index
    %c0_70 = arith.constant 0 : index
    %203 = vector.load %arg10[%c0_69, %c0_70] : memref<64x32xbf16, #tpu.memory_space<vmem>>, vector<32x32xbf16>
    %cst_71 = arith.constant dense<0.000000e+00> : vector<16x32xf32>
    %204 = tpu.matmul %202, %203, %cst_71 {dimension_numbers = #tpu.dot_dimension_numbers<[1], [0], [0], [1], [0, 0, 1, 1], [], []>} : vector<16x32xbf16>, vector<32x32xbf16>, vector<16x32xf32> -> vector<16x32xf32>
    %205 = arith.truncf %201 : vector<16x32xf32> to vector<16x32xbf16>
    %c32 = arith.constant 32 : index
    %c0_72 = arith.constant 0 : index
    %206 = vector.load %arg10[%c32, %c0_72] : memref<64x32xbf16, #tpu.memory_space<vmem>>, vector<32x32xbf16>
    %cst_73 = arith.constant dense<0.000000e+00> : vector<16x32xf32>
    %207 = tpu.matmul %205, %206, %cst_73 {dimension_numbers = #tpu.dot_dimension_numbers<[1], [0], [0], [1], [0, 0, 1, 1], [], []>} : vector<16x32xbf16>, vector<32x32xbf16>, vector<16x32xf32> -> vector<16x32xf32>
    %208 = arith.addf %204, %207 : vector<16x32xf32>
    %c0_74 = arith.constant 0 : index
    %c0_75 = arith.constant 0 : index
    %209 = vector.load %arg11[%c0_74, %c0_75] : memref<1x32xf32, #tpu.memory_space<vmem>>, vector<1x32xf32>
    %210 = vector.broadcast %209 : vector<1x32xf32> to vector<16x32xf32>
    %211 = arith.addf %208, %210 : vector<16x32xf32>
    %212 = arith.addf %1, %211 : vector<16x32xf32>
    %c0_76 = arith.constant 0 : index
    %c0_77 = arith.constant 0 : index
    %213 = vector.load %arg12[%c0_76, %c0_77] : memref<1x32xf32, #tpu.memory_space<vmem>>, vector<1x32xf32>
    %c0_78 = arith.constant 0 : index
    %c0_79 = arith.constant 0 : index
    %214 = vector.load %arg13[%c0_78, %c0_79] : memref<1x32xf32, #tpu.memory_space<vmem>>, vector<1x32xf32>
    %cst_80 = arith.constant dense<0.000000e+00> : vector<16xf32>
    %215 = vector.multi_reduction <add>, %212, %cst_80 [1] : vector<16x32xf32> to vector<16xf32>
    %216 = vector.shape_cast %215 : vector<16xf32> to vector<16x1xf32>
    %cst_81 = arith.constant 3.200000e+01 : f32
    %217 = vector.broadcast %cst_81 : f32 to vector<16x1xf32>
    %218 = arith.divf %216, %217 : vector<16x1xf32>
    %219 = vector.broadcast %218 : vector<16x1xf32> to vector<16x32xf32>
    %220 = arith.subf %212, %219 : vector<16x32xf32>
    %221 = arith.mulf %220, %220 : vector<16x32xf32>
    %cst_82 = arith.constant dense<0.000000e+00> : vector<16xf32>
    %222 = vector.multi_reduction <add>, %221, %cst_82 [1] : vector<16x32xf32> to vector<16xf32>
    %223 = vector.shape_cast %222 : vector<16xf32> to vector<16x1xf32>
    %cst_83 = arith.constant 3.200000e+01 : f32
    %224 = vector.broadcast %cst_83 : f32 to vector<16x1xf32>
    %225 = arith.divf %223, %224 : vector<16x1xf32>
    %226 = vector.broadcast %218 : vector<16x1xf32> to vector<16x32xf32>
    %227 = arith.subf %212, %226 : vector<16x32xf32>
    %cst_84 = arith.constant 9.99999974E-6 : f32
    %228 = vector.broadcast %cst_84 : f32 to vector<16x1xf32>
    %229 = arith.addf %225, %228 : vector<16x1xf32>
    %230 = math.rsqrt %229 : vector<16x1xf32>
    %231 = vector.broadcast %230 : vector<16x1xf32> to vector<16x32xf32>
    %232 = arith.mulf %227, %231 : vector<16x32xf32>
    %233 = vector.broadcast %213 : vector<1x32xf32> to vector<16x32xf32>
    %234 = arith.mulf %232, %233 : vector<16x32xf32>
    %235 = vector.broadcast %214 : vector<1x32xf32> to vector<16x32xf32>
    %236 = arith.addf %234, %235 : vector<16x32xf32>
    %237 = arith.truncf %236 : vector<16x32xf32> to vector<16x32xbf16>
    %c0_85 = arith.constant 0 : index
    %c0_86 = arith.constant 0 : index
    %238 = vector.load %arg14[%c0_85, %c0_86] : memref<32x128xbf16, #tpu.memory_space<vmem>>, vector<32x128xbf16>
    %cst_87 = arith.constant dense<0.000000e+00> : vector<16x128xf32>
    %239 = tpu.matmul %237, %238, %cst_87 {dimension_numbers = #tpu.dot_dimension_numbers<[1], [0], [0], [1], [0, 0, 1, 1], [], []>} : vector<16x32xbf16>, vector<32x128xbf16>, vector<16x128xf32> -> vector<16x128xf32>
    %c0_88 = arith.constant 0 : index
    %c0_89 = arith.constant 0 : index
    %240 = vector.load %arg15[%c0_88, %c0_89] : memref<1x128xf32, #tpu.memory_space<vmem>>, vector<1x128xf32>
    %241 = vector.broadcast %240 : vector<1x128xf32> to vector<16x128xf32>
    %242 = arith.addf %239, %241 : vector<16x128xf32>
    %cst_90 = arith.constant 5.000000e-01 : f32
    %243 = vector.broadcast %cst_90 : f32 to vector<16x128xf32>
    %244 = arith.mulf %243, %242 : vector<16x128xf32>
    %cst_91 = arith.constant 4.471500e-02 : f32
    %245 = vector.broadcast %cst_91 : f32 to vector<16x128xf32>
    %246 = arith.mulf %245, %242 : vector<16x128xf32>
    %247 = arith.mulf %246, %242 : vector<16x128xf32>
    %248 = arith.mulf %247, %242 : vector<16x128xf32>
    %249 = arith.addf %242, %248 : vector<16x128xf32>
    %cst_92 = arith.constant 0.797884583 : f32
    %250 = vector.broadcast %cst_92 : f32 to vector<16x128xf32>
    %251 = arith.mulf %250, %249 : vector<16x128xf32>
    %252 = math.tanh %251 : vector<16x128xf32>
    %cst_93 = arith.constant 1.000000e+00 : f32
    %253 = vector.broadcast %cst_93 : f32 to vector<16x128xf32>
    %254 = arith.addf %253, %252 : vector<16x128xf32>
    %255 = arith.mulf %244, %254 : vector<16x128xf32>
    %256 = arith.truncf %255 : vector<16x128xf32> to vector<16x128xbf16>
    %c0_94 = arith.constant 0 : index
    %c0_95 = arith.constant 0 : index
    %257 = vector.load %arg16[%c0_94, %c0_95] : memref<128x32xbf16, #tpu.memory_space<vmem>>, vector<128x32xbf16>
    %cst_96 = arith.constant dense<0.000000e+00> : vector<16x32xf32>
    %258 = tpu.matmul %256, %257, %cst_96 {dimension_numbers = #tpu.dot_dimension_numbers<[1], [0], [0], [1], [0, 0, 1, 1], [], []>} : vector<16x128xbf16>, vector<128x32xbf16>, vector<16x32xf32> -> vector<16x32xf32>
    %c0_97 = arith.constant 0 : index
    %c0_98 = arith.constant 0 : index
    %259 = vector.load %arg17[%c0_97, %c0_98] : memref<1x32xf32, #tpu.memory_space<vmem>>, vector<1x32xf32>
    %260 = vector.broadcast %259 : vector<1x32xf32> to vector<16x32xf32>
    %261 = arith.addf %258, %260 : vector<16x32xf32>
    %262 = arith.addf %212, %261 : vector<16x32xf32>
    %c0_99 = arith.constant 0 : index
    %c0_100 = arith.constant 0 : index
    %c0_101 = arith.constant 0 : index
    %263 = vector.load %arg18[%c0_99, %c0_100, %c0_101] : memref<1x16x32xf32, #tpu.memory_space<vmem>>, vector<1x16x32xf32>
    %264 = vector.shape_cast %263 : vector<1x16x32xf32> to vector<16x32xf32>
    %265 = vector.shape_cast %262 : vector<16x32xf32> to vector<1x16x32xf32>
    tpu.vector_store %arg18[%c0_99, %c0_100, %c0_101], %265 {strides = array<i32>} : memref<1x16x32xf32, #tpu.memory_space<vmem>>, vector<1x16x32xf32>,
    return
  }
  func.func @transform_0(%arg0: i32) -> (i32, i32, i32) {
    %c0_i32 = arith.constant 0 : i32
    %c0_i32_0 = arith.constant 0 : i32
    %c0_i32_1 = arith.constant 0 : i32
    return %arg0, %c0_i32, %c0_i32_0 : i32, i32, i32
  }
  func.func @transform_1(%arg0: i32) -> (i32, i32, i32) {
    %c0_i32 = arith.constant 0 : i32
    %c0_i32_0 = arith.constant 0 : i32
    %c0_i32_1 = arith.constant 0 : i32
    return %arg0, %c0_i32, %c0_i32_0 : i32, i32, i32
  }
  func.func @transform_2(%arg0: i32) -> (i32, i32) {
    %c0_i32 = arith.constant 0 : i32
    %c0_i32_0 = arith.constant 0 : i32
    %c0_i32_1 = arith.constant 0 : i32
    return %c0_i32, %c0_i32_0 : i32, i32
  }
  func.func @transform_3(%arg0: i32) -> (i32, i32) {
    %c0_i32 = arith.constant 0 : i32
    %c0_i32_0 = arith.constant 0 : i32
    %c0_i32_1 = arith.constant 0 : i32
    return %c0_i32, %c0_i32_0 : i32, i32
  }
  func.func @transform_4(%arg0: i32) -> (i32, i32) {
    %c0_i32 = arith.constant 0 : i32
    %c0_i32_0 = arith.constant 0 : i32
    %c0_i32_1 = arith.constant 0 : i32
    return %c0_i32, %c0_i32_0 : i32, i32
  }
  func.func @transform_5(%arg0: i32) -> (i32, i32) {
    %c0_i32 = arith.constant 0 : i32
    %c0_i32_0 = arith.constant 0 : i32
    %c0_i32_1 = arith.constant 0 : i32
    return %c0_i32, %c0_i32_0 : i32, i32
  }
  func.func @transform_6(%arg0: i32) -> (i32, i32) {
    %c0_i32 = arith.constant 0 : i32
    %c0_i32_0 = arith.constant 0 : i32
    %c0_i32_1 = arith.constant 0 : i32
    return %c0_i32, %c0_i32_0 : i32, i32
  }
  func.func @transform_7(%arg0: i32) -> (i32, i32) {
    %c0_i32 = arith.constant 0 : i32
    %c0_i32_0 = arith.constant 0 : i32
    %c0_i32_1 = arith.constant 0 : i32
    return %c0_i32, %c0_i32_0 : i32, i32
  }
  func.func @transform_8(%arg0: i32) -> (i32, i32) {
    %c0_i32 = arith.constant 0 : i32
    %c0_i32_0 = arith.constant 0 : i32
    %c0_i32_1 = arith.constant 0 : i32
    return %c0_i32, %c0_i32_0 : i32, i32
  }
  func.func @transform_9(%arg0: i32) -> (i32, i32) {
    %c0_i32 = arith.constant 0 : i32
    %c0_i32_0 = arith.constant 0 : i32
    %c0_i32_1 = arith.constant 0 : i32
    return %c0_i32, %c0_i32_0 : i32, i32
  }
  func.func @transform_10(%arg0: i32) -> (i32, i32) {
    %c0_i32 = arith.constant 0 : i32
    %c0_i32_0 = arith.constant 0 : i32
    %c0_i32_1 = arith.constant 0 : i32
    return %c0_i32, %c0_i32_0 : i32, i32
  }
  func.func @transform_11(%arg0: i32) -> (i32, i32) {
    %c0_i32 = arith.constant 0 : i32
    %c0_i32_0 = arith.constant 0 : i32
    %c0_i32_1 = arith.constant 0 : i32
    return %c0_i32, %c0_i32_0 : i32, i32
  }
  func.func @transform_12(%arg0: i32) -> (i32, i32) {
    %c0_i32 = arith.constant 0 : i32
    %c0_i32_0 = arith.constant 0 : i32
    %c0_i32_1 = arith.constant 0 : i32
    return %c0_i32, %c0_i32_0 : i32, i32
  }
  func.func @transform_13(%arg0: i32) -> (i32, i32) {
    %c0_i32 = arith.constant 0 : i32
    %c0_i32_0 = arith.constant 0 : i32
    %c0_i32_1 = arith.constant 0 : i32
    return %c0_i32, %c0_i32_0 : i32, i32
  }
  func.func @transform_14(%arg0: i32) -> (i32, i32) {
    %c0_i32 = arith.constant 0 : i32
    %c0_i32_0 = arith.constant 0 : i32
    %c0_i32_1 = arith.constant 0 : i32
    return %c0_i32, %c0_i32_0 : i32, i32
  }
  func.func @transform_15(%arg0: i32) -> (i32, i32) {
    %c0_i32 = arith.constant 0 : i32
    %c0_i32_0 = arith.constant 0 : i32
    %c0_i32_1 = arith.constant 0 : i32
    return %c0_i32, %c0_i32_0 : i32, i32
  }
  func.func @transform_16(%arg0: i32) -> (i32, i32) {
    %c0_i32 = arith.constant 0 : i32
    %c0_i32_0 = arith.constant 0 : i32
    %c0_i32_1 = arith.constant 0 : i32
    return %c0_i32, %c0_i32_0 : i32, i32
  }
  func.func @transform_17(%arg0: i32) -> (i32, i32, i32) {
    %c0_i32 = arith.constant 0 : i32
    %c0_i32_0 = arith.constant 0 : i32
    %c0_i32_1 = arith.constant 0 : i32
    return %arg0, %c0_i32, %c0_i32_0 : i32, i32, i32
  }
}

</mosaic_0001>

<bundles_post_ra>
// kernel: block_forward.1
= control target key start
LH: loop header
LB: loop body
LE: loop exit
PB: predicated region body
PF: predicated region fallthrough
CT: control target
= control target key end

     0   :  { %s3104_s0 = inlined_call_operand.vmem [shape: f32[2,16,32], index: 0, kind: input, shape index: {}]   ;;  %s3105_s1 = inlined_call_operand.vmem [shape: s32[2,128,1], index: 1, kind: input, shape index: {}]   ;;  %s3106_s2 = inlined_call_operand.vmem [shape: f32[1,32], index: 2, kind: input, shape index: {}]   ;;  %s3107_s3 = inlined_call_operand.vmem [shape: f32[1,32], index: 3, kind: input, shape index: {}]   ;;  %s3108_s4 = inlined_call_operand.vmem [shape: bf16[32,96], index: 4, kind: input, shape index: {}]   ;;  %s3109_s5 = inlined_call_operand.vmem [shape: bf16[32,32], index: 5, kind: input, shape index: {}]   ;;  %s3110_s6 = inlined_call_operand.vmem [shape: f32[1,32], index: 6, kind: input, shape index: {}]   ;;  %s3111_s7 = inlined_call_operand.vmem [shape: bf16[32,64], index: 7, kind: input, shape index: {}]   ;;  %s3112_s8 = inlined_call_operand.vmem [shape: f32[1,32], index: 8, kind: input, shape index: {}]   ;;  %s3113_s9 = inlined_call_operand.vmem [shape: bf16[64,32], index: 9, kind: input, shape index: {}]   ;;  %s3114_s10 = inlined_call_operand.vmem [shape: f32[1,32], index: 10, kind: input, shape index: {}]   ;;  %s3115_s11 = inlined_call_operand.vmem [shape: f32[1,32], index: 11, kind: input, shape index: {}]   ;;  %s3116_s12 = inlined_call_operand.vmem [shape: f32[1,32], index: 12, kind: input, shape index: {}]   ;;  %s3117_s13 = inlined_call_operand.vmem [shape: bf16[32,128], index: 13, kind: input, shape index: {}]   ;;  %s3118_s14 = inlined_call_operand.vmem [shape: f32[1,128], index: 14, kind: input, shape index: {}]   ;;  %s3119_s15 = inlined_call_operand.vmem [shape: bf16[128,32], index: 15, kind: input, shape index: {}]   ;;  %s3120_s16 = inlined_call_operand.vmem [shape: f32[1,32], index: 16, kind: input, shape index: {}]   ;;  %s3121_s17 = inlined_call_operand.hbm [shape: f32[2,16,32], index: 17, kind: output, shape index: {}]  }
   0x1   :  { %3125 = sst [smem:[#allocation6_spill]] %s3104_s0 }
   0x2   :  { %3126 = sst [smem:[#allocation7_spill]] %s3105_s1 }
   0x3   :  { %3127 = sst [smem:[#allocation8_spill]] %s3106_s2 }
   0x4   :  { %3128 = sst [smem:[#allocation9_spill]] %s3107_s3 }
   0x5   :  { %3129 = sst [smem:[#allocation10_spill]] %s3108_s4 }
   0x6   :  { %3130 = sst [smem:[#allocation11_spill]] %s3109_s5 }
   0x7   :  { %3131 = sst [smem:[#allocation12_spill]] %s3110_s6 }
   0x8   :  { %22 = vsyncpa [#allocation4], 0 }
   0x9   :  { %24 = vsyncpa [#allocation4 + $0x1], 0  ;;  %s2674_s24 = smov 0   ;;  %s2676_s25 = smov 0  }
   0xa   :  { %s2678_s26 = smov 0   ;;  %s2680_s27 = smov 0  }
   0xb LB: > { %s2695_s28 = sadd.s32 4294967295, %s2562_s27   ;;  %s2122_s29 = sadd.s32 4294967294, %s2562_s27   ;;  %s2562_s27 = sphi %s2680_s27, %s3146_s27   ;;  %s2558_s26 = sphi %s2678_s26, %s3145_s26   ;;  %s2554_s25 = sphi %s2676_s25, %s3144_s25   ;;  %s2550_s24 = sphi %s2674_s24, %s3143_s24  }
   0xc   : > { %s2699_s0 = sadd.s32 1, %s2562_s27   ;;  %s404_s30 = sadd.s32 1, %s2558_s26 }
   0xd   : > { %s401_s18 = ssub.s32 %s2562_s27, %s2699_s0  ;;  %p414_p0 = scmp.ne.s32.totalorder %s2558_s26, %s2554_s25 }
   0xe   : > { %p402_p1 = scmp.eq.s32.totalorder %s401_s18, 0  ;;  %p415_p2 = scmp.eq.s32.totalorder %s2695_s28, 1 }
   0xf   : > { %p420_p3 = scmp.ne.s32.totalorder %s2554_s25, %s2550_s24  ;;  %p421_p4 = scmp.eq.s32.totalorder %s2122_s29, 1 }
  0x10   : > { %s2710_s19 = scalar_select %p402_p1, %s2558_s26, %s404_s30  }
  0x11   : > { %p2712_p5 = por %p415_p2, %p414_p0  ;;  %p2716_p6 = por %p421_p4, %p420_p3 }
  0x12   : > { %p2125_p7 = scmp.ge.s32.totalorder %s2562_s27, 1  ;;  %p500_p8 = scmp.lt.s32.totalorder %s2562_s27, 3 }
  0x14   : > { %p501_p9 = pnand %p2125_p7, %p500_p8 }
  0x15   : > { %p557_p10 = scmp.lt.s32.totalorder (!%p501_p9), %s2695_s28, 1  ;;  %s3134_s30 = sld [smem:[#allocation6_spill]] (!%p501_p9) }
  0x16   : > { %504 = sbr.rel (%p501_p9) target bundleno = 2740 (0xab4), region = 88  ;;  %s3135_s4 = sld [smem:[#allocation10_spill]] (!%p501_p9) }
  0x17   : > { %s3136_s2 = sld [smem:[#allocation8_spill]] (!%p501_p9)  ;;  %s3122_s23 = smov (!%p501_p9), 96  }
  0x18   : > { %s3137_s3 = sld [smem:[#allocation9_spill]] (!%p501_p9)  ;;  %s2568_s29 = smov (!%p501_p9), 112  }
  0x19   : > { %s3138_s5 = sld [smem:[#allocation11_spill]] (!%p501_p9) }
  0x1a   : > { %s3141_s6 = sld [smem:[#allocation12_spill]] (!%p501_p9) }
  0x1b   : > { %s2724_s21 = scalar_select %p557_p10, %s2695_s28, 1  ;;  %vm572_vm0 = vcmask 261120   ;;  %v2564_v15 = vmov 0.0   ;;  %vm2565_vm1 = vmmov 0   ;;  %vm684_vm2 = vcmask 64512  }
  0x1c   : > { %v2436_v14 = vld [vmem:[%s3135_s4 + $0x8] sm:$0xff]   ;;  %2242 = vmatprep.subr.bf16.mxu0 %v2564_v15  ;;  %2246 = vmatprep.mubr.msk.bf16.mxu0 %vm2565_vm1, %v2564_v15  ;;  %v2437_v16 = vld [vmem:[%s3135_s4] sm:$0xff]   ;;  %s2572_s4 = smov 72   ;;  %vm732_vm3 = vcmask 130048   ;;  %vm935_vm4 = vcmask 130112   ;;  %vm1067_vm5 = vcmask 195712  }
  0x1d   : > { %s2187_s22 = sshll.u32 %s2724_s21, 4  ;;  %2243 = vmatpush3.bf16.msra.mxu0 %v2436_v14  ;;  %2250 = vmatprep.subr.bf16.mxu1 %v2564_v15  ;;  %v2131_v25 = vld [vmem:[%s3136_s2] ss:$0 sm:$0xff]  ;;  %s2570_s2 = smov 104   ;;  %vm1199_vm6 = vcmask 261312  }
  0x1e   : > { %s2730_s18 = scalar_lea.vmem %s3134_s30, %s2187_s22  ;;  %2244 = vmatprep.subr.bf16.mxu0 %v2564_v15  ;;  %2252 = vmatprep.mubr.msk.bf16.mxu1 %vm2565_vm1, %v2564_v15  ;;  %v2132_v29 = vld [vmem:[%s3137_s3] ss:$0 sm:$0xff]  ;;  %s2566_s22 = smov 88  }
  0x1f   : > { %v568_v0 = vld [vmem:[%s2730_s18] sm:$0xff]  ;;  %v569_v1 = vld [vmem:[%s2730_s18 + $0x8] sm:$0xff]  ;;  %s2569_s30 = smov 120   ;;  %s2571_s3 = smov 80  }
  0x20   : > { %v573_v2 = vsel %vm572_vm0, %v568_v0, 0.0  ;;  %v576_v3 = vsel %vm572_vm0, %v569_v1, 0.0 }
  0x21   : > { %574 = vadd.xlane.f32.xlu0 %v573_v2  ;;  %2245 = vmatpush3.bf16.msra.mxu0 %v2437_v16 }
  0x22   : > { %2256 = vmatprep.subr.bf16.mxu0 %v2564_v15 }
  0x25   : > { %577 = vadd.xlane.f32.xlu0 %v576_v3 }
  0xaa   : > { %v575_v4 = vpop.xlane.xlu0 %574 }
  0xab   : > { %v580_v5 = vmul.f32 0.03125, %v575_v4 }
  0xad   : > { %v582_v6 = vsub.f32 %v568_v0, %v580_v5 }
  0xae   : > { %v578_v7 = vpop.xlane.xlu0 %577 }
  0xaf   : > { %v581_v8 = vmul.f32 0.03125, %v578_v7  ;;  %v584_v9 = vmul.f32 %v582_v6, %v582_v6 }
  0xb1   : > { %v583_v10 = vsub.f32 %v569_v1, %v581_v8  ;;  %v586_v11 = vsel %vm572_vm0, %v584_v9, 0.0 }
  0xb2   : > { %587 = vadd.xlane.f32.xlu1 %v586_v11 }
  0xb3   : > { %v585_v12 = vmul.f32 %v583_v10, %v583_v10 }
  0xb5   : > { %v589_v13 = vsel %vm572_vm0, %v585_v12, 0.0 }
  0xb6   : > { %590 = vadd.xlane.f32.xlu1 %v589_v13 }
 0x13b   : > { %v588_v17 = vpop.xlane.xlu1 %587 }
 0x13c   : > { %v592_v18 = vmul.f32 0.03125, %v588_v17 }
 0x13e   : > { %v594_v19 = vadd.f32 1e-05, %v592_v18 }
 0x13f   : > { %v591_v20 = vpop.xlane.xlu1 %590 }
 0x140   : > { %2456 = vrsqrt.f32 %v594_v19  ;;  %v593_v21 = vmul.f32 0.03125, %v591_v20 }
 0x142   : > { %v595_v22 = vadd.f32 1e-05, %v593_v21 }
 0x144   : > { %2458 = vrsqrt.f32 %v595_v22 }
 0x14d   : > { %v2457_v23 = vpop.eup %2456 }
 0x14e   : > { %v598_v24 = vmul.f32 %v2457_v23, %v582_v6 }
 0x150   : > { %v606_v28 = vmul.f32 %v2131_v25, %v598_v24 }
 0x151   : > { %v2459_v26 = vpop.eup %2458 }
 0x152   : > { %v599_v27 = vmul.f32 %v2459_v26, %v583_v10  ;;  %v614_v31 = vadd.f32 %v2132_v29, %v606_v28 }
 0x154   : > { %v607_v30 = vmul.f32 %v2131_v25, %v599_v27 }
 0x156   : > { %v615_v32 = vadd.f32 %v2132_v29, %v607_v30 }
 0x158   : > { %v2758_v33 = vpack.c.bf16 %v615_v32, %v614_v31 }
 0x15a   : > { %2247 = vmatmul.mubr.msk.bf16.vlgmr.msra.gmra.mxu0 %vm572_vm0, %v2758_v33 }
 0x15b   : > { %2258 = vmatprep.mubr.msk.bf16.mxu0 %vm2565_vm1, %v2564_v15 }
 0x21a   : > { %v670_v34 = vpop.f32.mrf.mxu0 }
 0x21b   : > { %v677_v40 = vmul.f32 0.35355338, %v670_v34 }
 0x21c   : > { %v2248_v35 = vpop.f32.mrf.mxu0 }
 0x21e   : > { %v673_v36 = vpop.f32.mrf.mxu0 }
 0x21f   : > { %v678_v37 = vmul.f32 0.35355338, %v673_v36  ;;  %v2764_v38 = vpack.c.bf16 %v673_v36, %v670_v34 }
 0x220   : > { %v2249_v39 = vpop.f32.mrf.mxu0 }
 0x221   : > { %808 = vrot.lane.b32.xlu1 %v2764_v38, %s2566_s22  ;;  %682 = vrot.lane.b32.xlu0 %v2764_v38, %s3122_s23  ;;  %v679_v41 = vpack.c.bf16 %v678_v37, %v677_v40  ;;  %s2576_s22 = smov 56  }
 0x225   : > { %938 = vrot.lane.b32.xlu0 %v679_v41, %s2568_s29  ;;  %806 = vrot.lane.b32.xlu1 %v679_v41, %s2569_s30  ;;  %s3139_s30 = sld [smem:[#allocation7_spill]] }
 0x229   : > { %1070 = vrot.lane.b32.xlu0 %v679_v41, %s2570_s2  ;;  %940 = vrot.lane.b32.xlu1 %v2764_v38, %s2571_s3  ;;  %s2573_s2 = smov 64   ;;  %s2574_s3 = smov 48  }
 0x22d   : > { %1072 = vrot.lane.b32.xlu1 %v2764_v38, %s2572_s4  ;;  %s2575_s4 = smov 40  }
 0x293   : > { %v683_v42 = vpop.permute.xlu0 %682  ;;  %v809_v44 = vpop.permute.xlu1 %808 }
 0x294   : > { %v689_v43 = vsel %vm684_vm2, %v683_v42, 0  ;;  %v814_v46 = vsel %vm684_vm2, %v809_v44, 0 }
 0x295   : > { %2251 = vmatpush3.bf16.xpose.msra.mxu1 %v689_v43 }
 0x296   : > { %2262 = vmatprep.subr.bf16.mxu1 %v2564_v15 }
 0x297   : > { %v807_v45 = vpop.permute.xlu1 %806  ;;  %v939_v50 = vpop.permute.xlu0 %938 }
 0x29b   : > { %v941_v47 = vpop.permute.xlu1 %940  ;;  %v1071_v52 = vpop.permute.xlu0 %1070 }
 0x29c   : > { %2253 = vmatmul.mubr.msk.bf16.vlgmr.msra.gmra.mxu1 %vm684_vm2, %v679_v41  ;;  %v946_v48 = vsel %vm684_vm2, %v941_v47, 0 }
 0x29d   : > { %2263 = vmatpush3.bf16.xpose.msra.mxu1 %v814_v46  ;;  %2264 = vmatprep.mubr.msk.bf16.mxu1 %vm2565_vm1, %v2564_v15 }
 0x29e   : > { %2274 = vmatprep.subr.bf16.mxu1 %v2564_v15 }
 0x29f   : > { %v1073_v49 = vpop.permute.xlu1 %1072 }
 0x2a0   : > { %v1078_v51 = vsel %vm684_vm2, %v1073_v49, 0 }
 0x2a4   : > { %2265 = vmatmul.mubr.msk.bf16.vlgmr.msra.gmra.mxu1 %vm684_vm2, %v807_v45 }
 0x2a5   : > { %2275 = vmatpush3.bf16.xpose.msra.mxu1 %v946_v48  ;;  %2276 = vmatprep.mubr.msk.bf16.mxu1 %vm2565_vm1, %v2564_v15 }
 0x2a6   : > { %2286 = vmatprep.subr.bf16.mxu1 %v2564_v15 }
 0x2ac   : > { %2277 = vmatmul.mubr.msk.bf16.vlgmr.msra.gmra.mxu1 %vm684_vm2, %v939_v50 }
 0x2ad   : > { %2287 = vmatpush3.bf16.xpose.msra.mxu1 %v1078_v51  ;;  %2288 = vmatprep.mubr.msk.bf16.mxu1 %vm2565_vm1, %v2564_v15 }
 0x2ae   : > { %2298 = vmatprep.subr.bf16.mxu1 %v2564_v15 }
 0x2b4   : > { %2289 = vmatmul.mubr.msk.bf16.vlgmr.msra.gmra.mxu1 %vm684_vm2, %v1071_v52 }
 0x2b5   : > { %2302 = vmatprep.mubr.msk.bf16.mxu1 %vm2565_vm1, %v2564_v15 }
 0x35c   : > { %v725_v53 = vpop.f32.mrf.mxu1 }
 0x35d   : > { %v733_v54 = vsel %vm732_vm3, %v725_v53, -inf }
 0x35e   : > { %734 = vmax.xlane.f32.xlu1 %v733_v54  ;;  %v2254_v55 = vpop.f32.mrf.mxu1 }
 0x360   : > { %v728_v56 = vpop.f32.mrf.mxu1 }
 0x361   : > { %v736_v57 = vsel %vm732_vm3, %v728_v56, -inf }
 0x362   : > { %737 = vmax.xlane.f32.xlu0 %v736_v57  ;;  %v2255_v58 = vpop.f32.mrf.mxu1 }
 0x364   : > { %v850_v59 = vpop.f32.mrf.mxu1 }
 0x365   : > { %v857_v60 = vsel %vm732_vm3, %v850_v59, -inf }
 0x366   : > { %858 = vmax.xlane.f32.xlu0 %v857_v60  ;;  %v2266_v61 = vpop.f32.mrf.mxu1 }
 0x368   : > { %v853_v62 = vpop.f32.mrf.mxu1 }
 0x369   : > { %v860_v63 = vsel %vm732_vm3, %v853_v62, -inf }
 0x36a   : > { %861 = vmax.xlane.f32.xlu0 %v860_v63  ;;  %v2267_v0 = vpop.f32.mrf.mxu1 }
 0x36c   : > { %v982_v1 = vpop.f32.mrf.mxu1 }
 0x36d   : > { %v989_v2 = vsel %vm732_vm3, %v982_v1, -inf }
 0x36e   : > { %990 = vmax.xlane.f32.xlu1 %v989_v2  ;;  %v2278_v3 = vpop.f32.mrf.mxu1 }
 0x370   : > { %v985_v4 = vpop.f32.mrf.mxu1 }
 0x371   : > { %v992_v5 = vsel %vm732_vm3, %v985_v4, -inf }
 0x372   : > { %993 = vmax.xlane.f32.xlu0 %v992_v5  ;;  %v2279_v6 = vpop.f32.mrf.mxu1 }
 0x374   : > { %v1114_v7 = vpop.f32.mrf.mxu1 }
 0x375   : > { %v1121_v8 = vsel %vm732_vm3, %v1114_v7, -inf }
 0x376   : > { %1122 = vmax.xlane.f32.xlu1 %v1121_v8  ;;  %v2290_v9 = vpop.f32.mrf.mxu1 }
 0x378   : > { %v1117_v10 = vpop.f32.mrf.mxu1 }
 0x379   : > { %v1124_v11 = vsel %vm732_vm3, %v1117_v10, -inf }
 0x37a   : > { %1125 = vmax.xlane.f32.xlu0 %v1124_v11  ;;  %v2291_v12 = vpop.f32.mrf.mxu1 }
 0x387   : > { %756 = vrot.lane.b32.xlu1 %v2764_v38, %s2573_s2  ;;  %s3124_s2 = smov 8  }
 0x3e7   : > { %v735_v13 = vpop.xlane.xlu1 %734 }
 0x3e8   : > { %v739_v14 = vsub.f32 %v725_v53, %v735_v13 }
 0x3ea   : > { %v741_v16 = vmul.f32 1.442695, %v739_v14 }
 0x3eb   : > { %v738_v17 = vpop.xlane.xlu0 %737 }
 0x3ec   : > { %2460 = vpow2.f32 %v741_v16  ;;  %v740_v18 = vsub.f32 %v728_v56, %v738_v17 }
 0x3ee   : > { %v743_v19 = vmul.f32 1.442695, %v740_v18 }
 0x3ef   : > { %v859_v20 = vpop.xlane.xlu0 %858 }
 0x3f0   : > { %2462 = vpow2.f32 %v743_v19  ;;  %v863_v21 = vsub.f32 %v850_v59, %v859_v20 }
 0x3f2   : > { %v865_v22 = vmul.f32 1.442695, %v863_v21 }
 0x3f3   : > { %v862_v23 = vpop.xlane.xlu0 %861 }
 0x3f4   : > { %2464 = vpow2.f32 %v865_v22  ;;  %v864_v24 = vsub.f32 %v853_v62, %v862_v23  ;;  %v2438_v23 = vld [vmem:[%s3111_s7 + $0x8] sm:$0xff]  }
 0x3f6   : > { %v867_v25 = vmul.f32 1.442695, %v864_v24 }
 0x3f7   : > { %v991_v26 = vpop.xlane.xlu1 %990 }
 0x3f8   : > { %2466 = vpow2.f32 %v867_v25  ;;  %v995_v27 = vsub.f32 %v982_v1, %v991_v26  ;;  %v2439_v25 = vld [vmem:[%s3111_s7] sm:$0xff]   ;;  %v2577_v26 = vmov 0  }
 0x3f9   : > { %v2461_v28 = vpop.eup %2460  ;;  %2434 = vset.pattern.permute.xlu1 %v2577_v26  ;;  %2435 = vset.pattern.permute.xlu0 %v2577_v26 }
 0x3fa   : > { %v997_v29 = vmul.f32 1.442695, %v995_v27  ;;  %v745_v30 = vsel %vm732_vm3, %v2461_v28, 0.0  ;;  %v2440_v27 = vld [vmem:[%s3138_s5 + $0x8] sm:$0xff]  }
 0x3fb   : > { %v994_v31 = vpop.xlane.xlu0 %993  ;;  %746 = vadd.xlane.f32.xlu1 %v745_v30  ;;  %2299 = vmatpush3.bf16.msra.mxu1 %v2440_v27 }
 0x3fc   : > { %2468 = vpow2.f32 %v997_v29  ;;  %v996_v32 = vsub.f32 %v985_v4, %v994_v31  ;;  %2300 = vmatprep.subr.bf16.mxu1 %v2564_v15 }
 0x3fd   : > { %v2463_v34 = vpop.eup %2462 }
 0x3fe   : > { %v999_v35 = vmul.f32 1.442695, %v996_v32  ;;  %v748_v36 = vsel %vm732_vm3, %v2463_v34, 0.0 }
 0x3ff   : > { %v1123_v37 = vpop.xlane.xlu1 %1122  ;;  %749 = vadd.xlane.f32.xlu0 %v748_v36 }
 0x400   : > { %2470 = vpow2.f32 %v999_v35  ;;  %v1127_v39 = vsub.f32 %v1114_v7, %v1123_v37 }
 0x401   : > { %v2465_v40 = vpop.eup %2464 }
 0x402   : > { %v1129_v41 = vmul.f32 1.442695, %v1127_v39  ;;  %v869_v42 = vsel %vm732_vm3, %v2465_v40, 0.0 }
 0x403   : > { %870 = vadd.xlane.f32.xlu1 %v869_v42  ;;  %v757_v43 = vpop.permute.xlu1 %756  ;;  %v1126_v44 = vpop.xlane.xlu0 %1125 }
 0x404   : > { %2472 = vpow2.f32 %v1129_v41  ;;  %v1128_v45 = vsub.f32 %v1117_v10, %v1126_v44  ;;  %2257 = vmatpush3.bf16.msra.mxu0 %v757_v43 }
 0x405   : > { %v2467_v46 = vpop.eup %2466  ;;  %2268 = vmatprep.subr.bf16.mxu0 %v2564_v15 }
 0x406   : > { %v1131_v47 = vmul.f32 1.442695, %v1128_v45  ;;  %v872_v48 = vsel %vm732_vm3, %v2467_v46, 0.0 }
 0x407   : > { %873 = vadd.xlane.f32.xlu0 %v872_v48 }
 0x408   : > { %2474 = vpow2.f32 %v1131_v47 }
 0x409   : > { %v2469_v49 = vpop.eup %2468 }
 0x40a   : > { %v1001_v50 = vsel %vm732_vm3, %v2469_v49, 0.0 }
 0x40b   : > { %1002 = vadd.xlane.f32.xlu1 %v1001_v50 }
 0x40d   : > { %v2471_v51 = vpop.eup %2470 }
 0x40e   : > { %v1004_v52 = vsel %vm732_vm3, %v2471_v51, 0.0 }
 0x40f   : > { %1005 = vadd.xlane.f32.xlu0 %v1004_v52 }
 0x411   : > { %v2473_v53 = vpop.eup %2472 }
 0x412   : > { %v1133_v54 = vsel %vm732_vm3, %v2473_v53, 0.0 }
 0x413   : > { %1134 = vadd.xlane.f32.xlu1 %v1133_v54 }
 0x415   : > { %v2475_v55 = vpop.eup %2474 }
 0x416   : > { %v1136_v56 = vsel %vm732_vm3, %v2475_v55, 0.0 }
 0x417   : > { %1137 = vadd.xlane.f32.xlu0 %v1136_v56 }
 0x424   : > { %1012 = vrot.lane.b32.xlu1 %v2764_v38, %s2574_s3  ;;  %s2579_s3 = smov 16  }
 0x428   : > { %1144 = vrot.lane.b32.xlu1 %v2764_v38, %s2575_s4  ;;  %s2188_s4 = sshll.u32 %s2724_s21, 7 }
 0x429   : > { %s2854_s23 = scalar_lea.vmem %s3139_s30, %s2188_s4  ;;  %s554_s30 = sand.u32 1, %s2554_s25  }
 0x42a   : > { %v1340_v44 = vld [vmem:[%s2854_s23] sm:$0xff]  ;;  %v1342_v47 = vld [vmem:[%s2854_s23 + $0x10] sm:$0xff]  ;;  %v1341_v48 = vld [vmem:[%s2854_s23 + $0x8] sm:$0xff]  ;;  %s2189_s4 = sshll.u32 %s2695_s28, 8  ;;  %s3063_s21 = scalar_lea.sflag [#allocation4], %s554_s30 }
 0x42b   : > { %v1344_v52 = vld [vmem:[%s2854_s23 + $0x20] sm:$0xff]  ;;  %v1345_v56 = vld [vmem:[%s2854_s23 + $0x28] sm:$0xff] }
 0x42d   : > { %880 = vrot.lane.b32.xlu0 %v2764_v38, %s2576_s22 }
 0x484   : > { %v747_v57 = vpop.xlane.xlu1 %746 }
 0x485   : > { %2476 = vrcp.f32 %v747_v57  ;;  %v1346_v57 = vld [vmem:[%s2854_s23 + $0x30] sm:$0xff] }
 0x488   : > { %v750_v58 = vpop.xlane.xlu0 %749 }
 0x489   : > { %2478 = vrcp.f32 %v750_v58  ;;  %v1347_v58 = vld [vmem:[%s2854_s23 + $0x38] sm:$0xff] }
 0x48c   : > { %v871_v60 = vpop.xlane.xlu1 %870 }
 0x490   : > { %v874_v59 = vpop.xlane.xlu0 %873 }
 0x491   : > { %2480 = vrcp.f32 %v874_v59  ;;  %v1348_v59 = vld [vmem:[%s2854_s23 + $0x40] sm:$0xff] }
 0x492   : > { %v2477_v61 = vpop.eup %2476  ;;  %2482 = vrcp.f32 %v871_v60  ;;  %v1349_v60 = vld [vmem:[%s2854_s23 + $0x48] sm:$0xff] }
 0x493   : > { %v753_v63 = vmul.f32 %v2477_v61, %v2461_v28  ;;  %v2441_v28 = vld [vmem:[%s3138_s5] sm:$0xff]   ;;  %v1350_v61 = vld [vmem:[%s2854_s23 + $0x50] sm:$0xff] }
 0x494   : > { %v1003_v2 = vpop.xlane.xlu1 %1002  ;;  %2301 = vmatpush3.bf16.msra.mxu1 %v2441_v28 }
 0x496   : > { %v2479_v62 = vpop.eup %2478 }
 0x497   : > { %v754_v0 = vmul.f32 %v2479_v62, %v2463_v34  ;;  %v1351_v62 = vld [vmem:[%s2854_s23 + $0x58] sm:$0xff] }
 0x498   : > { %v1006_v1 = vpop.xlane.xlu0 %1005 }
 0x499   : > { %v755_v3 = vpack.c.bf16 %v754_v0, %v753_v63  ;;  %2484 = vrcp.f32 %v1006_v1  ;;  %v1352_v63 = vld [vmem:[%s2854_s23 + $0x60] sm:$0xff]  ;;  %v1353_v0 = vld [vmem:[%s2854_s23 + $0x68] sm:$0xff]  ;;  %v1354_v1 = vld [vmem:[%s2854_s23 + $0x70] sm:$0xff] }
 0x49a   : > { %2486 = vrcp.f32 %v1003_v2  ;;  %v1355_v2 = vld [vmem:[%s2854_s23 + $0x78] sm:$0xff] }
 0x49b   : > { %2259 = vmatmul.mubr.msk.bf16.vlgmr.msra.gmra.mxu0 %vm732_vm3, %v755_v3  ;;  %v2151_v3 = vld [vmem:[%s3112_s8] ss:$0 sm:$0xff] }
 0x49c   : > { %2270 = vmatprep.mubr.msk.bf16.mxu0 %vm2565_vm1, %v2564_v15  ;;  %v1135_v6 = vpop.xlane.xlu1 %1134 }
 0x49e   : > { %v2481_v38 = vpop.eup %2480 }
 0x49f   : > { %v2483_v5 = vpop.eup %2482  ;;  %v878_v7 = vmul.f32 %v2481_v38, %v2467_v46 }
 0x4a0   : > { %v1138_v4 = vpop.xlane.xlu0 %1137  ;;  %v877_v9 = vmul.f32 %v2483_v5, %v2465_v40  ;;  %v1013_v12 = vpop.permute.xlu1 %1012 }
 0x4a1   : > { %2488 = vrcp.f32 %v1138_v4 }
 0x4a2   : > { %2490 = vrcp.f32 %v1135_v6  ;;  %v879_v10 = vpack.c.bf16 %v878_v7, %v877_v9  ;;  %v1356_v9 = vlaneseq }
 0x4a4   : > { %v881_v8 = vpop.permute.xlu0 %880  ;;  %v1145_v19 = vpop.permute.xlu1 %1144 }
 0x4a5   : > { %2269 = vmatpush3.bf16.msra.mxu0 %v881_v8 }
 0x4a6   : > { %2280 = vmatprep.subr.bf16.mxu0 %v2564_v15  ;;  %v2485_v11 = vpop.eup %2484 }
 0x4a7   : > { %v2487_v13 = vpop.eup %2486  ;;  %v1010_v14 = vmul.f32 %v2485_v11, %v2471_v51  ;;  %v1343_v51 = vld [vmem:[%s2854_s23 + $0x18] sm:$0xff]  ;;  %s3140_s23 = smov 96  }
 0x4a8   : > { %2271 = vmatmul.mubr.msk.bf16.vlgmr.msra.gmra.mxu0 %vm732_vm3, %v879_v10  ;;  %v1009_v16 = vmul.f32 %v2487_v13, %v2469_v49  ;;  %v2881_v10 = vand.u32 127, %v1356_v9 }
 0x4a9   : > { %2281 = vmatpush3.bf16.msra.mxu0 %v1013_v12  ;;  %2282 = vmatprep.mubr.msk.bf16.mxu0 %vm2565_vm1, %v2564_v15 }
 0x4aa   : > { %2292 = vmatprep.subr.bf16.mxu0 %v2564_v15  ;;  %v1011_v17 = vpack.c.bf16 %v1010_v14, %v1009_v16 }
 0x4ae   : > { %v2489_v18 = vpop.eup %2488 }
 0x4af   : > { %v2491_v20 = vpop.eup %2490  ;;  %v1142_v21 = vmul.f32 %v2489_v18, %v2475_v55 }
 0x4b0   : > { %2283 = vmatmul.mubr.msk.bf16.vlgmr.msra.gmra.mxu0 %vm732_vm3, %v1011_v17  ;;  %v1141_v22 = vmul.f32 %v2491_v20, %v2473_v53 }
 0x4b1   : > { %2293 = vmatpush3.bf16.msra.mxu0 %v1145_v19  ;;  %2294 = vmatprep.mubr.msk.bf16.mxu0 %vm2565_vm1, %v2564_v15 }
 0x4b2   : > { %2306 = vmatprep.subr.bf16.mxu0 %v2564_v15  ;;  %v1143_v24 = vpack.c.bf16 %v1142_v21, %v1141_v22 }
 0x4b8   : > { %2295 = vmatmul.mubr.msk.bf16.vlgmr.msra.gmra.mxu0 %vm732_vm3, %v1143_v24 }
 0x4b9   : > { %2307 = vmatpush3.bf16.msra.mxu0 %v2438_v23  ;;  %2310 = vmatprep.mubr.msk.bf16.mxu0 %vm2565_vm1, %v2564_v15 }
 0x4ba   : > { %2308 = vmatprep.subr.bf16.mxu0 %v2564_v15 }
 0x4bd   : > { %2309 = vmatpush3.bf16.msra.mxu0 %v2439_v25 }
 0x4be   : > { %2332 = vmatprep.subr.bf16.mxu0 %v2564_v15 }
 0x4c0   : > { %2311 = vmatmul.mubr.msk.bf16.vlgmr.msra.gmra.mxu0 %vm572_vm0, %v2758_v33 }
 0x4c1   : > { %2336 = vmatprep.mubr.msk.bf16.mxu0 %vm2565_vm1, %v2564_v15 }
 0x55b   : > { %v796_v29 = vpop.f32.mrf.mxu0 }
 0x55c   : > { %803 = vst.msk [vmem:[#allocation2] sm:$0xff] %vm684_vm2, %v796_v29 }
 0x55d   : > { %v2260_v33 = vpop.f32.mrf.mxu0 }
 0x55f   : > { %v799_v30 = vpop.f32.mrf.mxu0 }
 0x560   : > { %804 = vst.msk [vmem:[#allocation2 + $0x8] sm:$0xff] %vm684_vm2, %v799_v30 }
 0x561   : > { %v2261_v31 = vpop.f32.mrf.mxu0 }
 0x568   : > { %v920_v32 = vpop.f32.mrf.mxu0 }
 0x569   : > { %929 = vrot.lane.b32.xlu1 %v920_v32, %s3124_s2 }
 0x56a   : > { %v2272_v34 = vpop.f32.mrf.mxu0 }
 0x56c   : > { %v923_v35 = vpop.f32.mrf.mxu0 }
 0x56d   : > { %931 = vrot.lane.b32.xlu0 %v923_v35, %s3124_s2  ;;  %s2580_s2 = smov 24  }
 0x56e   : > { %v2273_v36 = vpop.f32.mrf.mxu0 }
 0x570   : > { %v1052_v37 = vpop.f32.mrf.mxu0 }
 0x571   : > { %1061 = vrot.lane.b32.xlu1 %v1052_v37, %s2579_s3 }
 0x572   : > { %v2284_v39 = vpop.f32.mrf.mxu0 }
 0x574   : > { %v1055_v40 = vpop.f32.mrf.mxu0 }
 0x575   : > { %1063 = vrot.lane.b32.xlu0 %v1055_v40, %s2579_s3  ;;  %s2581_s3 = smov 32  }
 0x576   : > { %v2285_v41 = vpop.f32.mrf.mxu0 }
 0x578   : > { %v1184_v42 = vpop.f32.mrf.mxu0 }
 0x579   : > { %1193 = vrot.lane.b32.xlu1 %v1184_v42, %s2580_s2 }
 0x57a   : > { %v2296_v43 = vpop.f32.mrf.mxu0 }
 0x57c   : > { %v1187_v45 = vpop.f32.mrf.mxu0 }
 0x57d   : > { %1359 = vperm.xlu1 %2434, %v1340_v44   ;;  %1195 = vrot.lane.b32.xlu0 %v1187_v45, %s2580_s2  ;;  %s2126_s2 = sshll.u32 %s554_s30, 4 }
 0x57e   : > { %v2297_v46 = vpop.f32.mrf.mxu0 }
 0x580   : > { %v2859_v49 = vpop.f32.mrf.mxu0 }
 0x581   : > { %1365 = vperm.xlu1 %2434, %v1342_v47   ;;  %1362 = vperm.xlu0 %2435, %v1341_v48  }
 0x582   : > { %v2312_v50 = vpop.f32.mrf.mxu0 }
 0x584   : > { %v2863_v53 = vpop.f32.mrf.mxu0 }
 0x585   : > { %v1446_v54 = vpack.c.bf16 %v2863_v53, %v2859_v49  ;;  %1368 = vperm.xlu1 %2434, %v1343_v51   ;;  %1371 = vperm.xlu0 %2435, %v1344_v52  }
 0x586   : > { %v2313_v55 = vpop.f32.mrf.mxu0 }
 0x587   : > { %2314 = vmatprep.subr.bf16.mxu1 %v1446_v54 }
 0x589   : > { %1374 = vperm.xlu1 %2434, %v1345_v56   ;;  %1377 = vperm.xlu0 %2435, %v1346_v57  }
 0x58d   : > { %1380 = vperm.xlu1 %2434, %v1347_v58   ;;  %1383 = vperm.xlu0 %2435, %v1348_v59  }
 0x591   : > { %1386 = vperm.xlu1 %2434, %v1349_v60   ;;  %1389 = vperm.xlu0 %2435, %v1350_v61  }
 0x595   : > { %1392 = vperm.xlu1 %2434, %v1351_v62   ;;  %1395 = vperm.xlu0 %2435, %v1352_v63  }
 0x599   : > { %1398 = vperm.xlu1 %2434, %v1353_v0   ;;  %1401 = vperm.xlu0 %2435, %v1354_v1  }
 0x59d   : > { %1404 = vperm.xlu1 %2434, %v1355_v2   ;;  %1335 = vrot.lane.b32.xlu0 %v2151_v3, %s2581_s3  ;;  %s556_s3 = scalar_lea.vmem [#allocation3], %s2126_s2  ;;  %s2582_s2 = smov [#allocation3]  }
 0x59e   : > { %s2506_s5 = sshll.u32 %s2582_s2, 4  ;;  %s2507_s5 = int_to_ptr.vmem [resolvable:$false] %s2506_s5 }
 0x5db   : > { %v930_v38 = vpop.permute.xlu1 %929 }
 0x5dc   : > { %936 = vst.msk [vmem:[#allocation2] sm:$0xff] %vm935_vm4, %v930_v38 }
 0x5df   : > { %v932_v4 = vpop.permute.xlu0 %931 }
 0x5e0   : > { %937 = vst.msk [vmem:[#allocation2 + $0x8] sm:$0xff] %vm935_vm4, %v932_v4 }
 0x5e3   : > { %v1062_v5 = vpop.permute.xlu1 %1061 }
 0x5e4   : > { %1068 = vst.msk [vmem:[#allocation2] sm:$0xff] %vm1067_vm5, %v1062_v5 }
 0x5e7   : > { %v1064_v6 = vpop.permute.xlu0 %1063 }
 0x5e8   : > { %1069 = vst.msk [vmem:[#allocation2 + $0x8] sm:$0xff] %vm1067_vm5, %v1064_v6 }
 0x5eb   : > { %v1194_v7 = vpop.permute.xlu1 %1193 }
 0x5ec   : > { %1200 = vst.msk [vmem:[#allocation2] sm:$0xff] %vm1199_vm6, %v1194_v7 }
 0x5ef   : > { %v1196_v8 = vpop.permute.xlu0 %1195 }
 0x5f0   : > { %1201 = vst.msk [vmem:[#allocation2 + $0x8] sm:$0xff] %vm1199_vm6, %v1196_v8 }
 0x5f3   : > { %v1202_v11 = vld [vmem:[#allocation2] sm:$0xff] }
 0x5f7   : > { %v1203_v12 = vld [vmem:[#allocation2 + $0x8] sm:$0xff] }
 0x5f8   : > { %v1360_v13 = vpop.permute.xlu1 %1359  ;;  %v1204_v14 = vpack.c.bf16 %v1203_v12, %v1202_v11 }
 0x5f9   : > { %vm1406_vm7 = vcmp.eq.s32.totalorder %v1360_v13, %v2881_v10 }
 0x5fa   : > { %2303 = vmatmul.mubr.msk.bf16.vlgmr.msra.gmra.mxu1 %vm572_vm0, %v1204_v14  ;;  %v1422_v18 = vsel %vm1406_vm7, 1.0, %v2564_v15 }
 0x5fb   : > { %2315 = vmatpush3.bf16.msra.mxu1 %v1446_v54 }
 0x5fc   : > { %v1366_v16 = vpop.permute.xlu1 %1365  ;;  %v1363_v17 = vpop.permute.xlu0 %1362  ;;  %2356 = vmatprep.subr.bf16.mxu1 %v2564_v15 }
 0x5fd   : > { %vm1407_vm8 = vcmp.eq.s32.totalorder %v1363_v17, %v2881_v10  ;;  %vm1408_vm9 = vcmp.eq.s32.totalorder %v1366_v16, %v2881_v10 }
 0x5fe   : > { %v1423_v19 = vsel %vm1407_vm8, 1.0, %v2564_v15  ;;  %v1424_v23 = vsel %vm1408_vm9, 1.0, %v2564_v15 }
 0x5ff   : > { %v1438_v20 = vpack.c.bf16 %v1423_v19, %v1422_v18 }
 0x600   : > { %v1369_v21 = vpop.permute.xlu1 %1368  ;;  %v1372_v22 = vpop.permute.xlu0 %1371 }
 0x601   : > { %vm1409_vm10 = vcmp.eq.s32.totalorder %v1369_v21, %v2881_v10  ;;  %2316 = vmatprep.mubr.msk.bf16.mxu1 %vm732_vm3, %v1438_v20  ;;  %vm1410_vm11 = vcmp.eq.s32.totalorder %v1372_v22, %v2881_v10 }
 0x602   : > { %v1425_v24 = vsel %vm1409_vm10, 1.0, %v2564_v15  ;;  %v1426_v28 = vsel %vm1410_vm11, 1.0, %v2564_v15 }
 0x603   : > { %v1439_v25 = vpack.c.bf16 %v1425_v24, %v1424_v23 }
 0x604   : > { %v1375_v26 = vpop.permute.xlu1 %1374  ;;  %v1378_v27 = vpop.permute.xlu0 %1377 }
 0x605   : > { %vm1411_vm12 = vcmp.eq.s32.totalorder %v1375_v26, %v2881_v10  ;;  %2317 = vmatmul.mubr.msk.bf16.vlgmr.msra.gmra.mxu1 %vm732_vm3, %v1439_v25  ;;  %vm1412_vm13 = vcmp.eq.s32.totalorder %v1378_v27, %v2881_v10 }
 0x606   : > { %v1427_v29 = vsel %vm1411_vm12, 1.0, %v2564_v15  ;;  %v1428_v32 = vsel %vm1412_vm13, 1.0, %v2564_v15 }
 0x607   : > { %v1440_v33 = vpack.c.bf16 %v1427_v29, %v1426_v28 }
 0x608   : > { %v1381_v30 = vpop.permute.xlu1 %1380  ;;  %v1384_v31 = vpop.permute.xlu0 %1383 }
 0x609   : > { %vm1413_vm14 = vcmp.eq.s32.totalorder %v1381_v30, %v2881_v10  ;;  %2320 = vmatprep.mubr.msk.bf16.mxu1 %vm732_vm3, %v1440_v33  ;;  %vm1414_vm15 = vcmp.eq.s32.totalorder %v1384_v31, %v2881_v10 }
 0x60a   : > { %v1429_v34 = vsel %vm1413_vm14, 1.0, %v2564_v15  ;;  %v1430_v39 = vsel %vm1414_vm15, 1.0, %v2564_v15 }
 0x60b   : > { %v1441_v35 = vpack.c.bf16 %v1429_v34, %v1428_v32 }
 0x60c   : > { %v1387_v36 = vpop.permute.xlu1 %1386  ;;  %v1390_v37 = vpop.permute.xlu0 %1389 }
 0x60d   : > { %vm1415_vm2 = vcmp.eq.s32.totalorder %v1387_v36, %v2881_v10  ;;  %2321 = vmatmul.mubr.msk.bf16.gmra.mxu1 %vm732_vm3, %v1441_v35  ;;  %vm1416_vm4 = vcmp.eq.s32.totalorder %v1390_v37, %v2881_v10 }
 0x60e   : > { %v1431_v40 = vsel %vm1415_vm2, 1.0, %v2564_v15  ;;  %v1432_v44 = vsel %vm1416_vm4, 1.0, %v2564_v15 }
 0x60f   : > { %v1442_v41 = vpack.c.bf16 %v1431_v40, %v1430_v39 }
 0x610   : > { %v1393_v42 = vpop.permute.xlu1 %1392  ;;  %v1396_v43 = vpop.permute.xlu0 %1395 }
 0x611   : > { %vm1417_vm5 = vcmp.eq.s32.totalorder %v1393_v42, %v2881_v10  ;;  %2324 = vmatprep.mubr.msk.bf16.mxu1 %vm732_vm3, %v1442_v41  ;;  %vm1418_vm6 = vcmp.eq.s32.totalorder %v1396_v43, %v2881_v10 }
 0x612   : > { %v1433_v45 = vsel %vm1417_vm5, 1.0, %v2564_v15  ;;  %v1434_v50 = vsel %vm1418_vm6, 1.0, %v2564_v15 }
 0x613   : > { %v1443_v46 = vpack.c.bf16 %v1433_v45, %v1432_v44 }
 0x614   : > { %v1399_v47 = vpop.permute.xlu1 %1398  ;;  %v1402_v48 = vpop.permute.xlu0 %1401 }
 0x615   : > { %vm1419_vm7 = vcmp.eq.s32.totalorder %v1399_v47, %v2881_v10  ;;  %2325 = vmatmul.mubr.msk.bf16.gmra.mxu1 %vm732_vm3, %v1443_v46  ;;  %vm1420_vm8 = vcmp.eq.s32.totalorder %v1402_v48, %v2881_v10 }
 0x616   : > { %v1435_v51 = vsel %vm1419_vm7, 1.0, %v2564_v15  ;;  %v1436_v58 = vsel %vm1420_vm8, 1.0, %v2564_v15 }
 0x617   : > { %v1444_v52 = vpack.c.bf16 %v1435_v51, %v1434_v50 }
 0x618   : > { %v1405_v54 = vpop.permute.xlu1 %1404  ;;  %v1336_v55 = vpop.permute.xlu0 %1335 }
 0x619   : > { %vm1421_vm9 = vcmp.eq.s32.totalorder %v1405_v54, %v2881_v10  ;;  %v1338_v56 = vadd.f32 %v1336_v55, %v2859_v49  ;;  %v1339_v57 = vadd.f32 %v1336_v55, %v2863_v53  ;;  %2328 = vmatprep.mubr.msk.bf16.mxu1 %vm732_vm3, %v1444_v52  ;;  %v2442_v49 = vld [vmem:[%s3113_s9 + $0x18] sm:$0xff]   ;;  %v2443_v53 = vld [vmem:[%s3113_s9 + $0x10] sm:$0xff]  }
 0x61a   : > { %v1437_v59 = vsel %vm1421_vm9, 1.0, %v2564_v15  ;;  %2333 = vmatpush3.bf16.msra.mxu0 %v2442_v49 }
 0x61b   : > { %v1445_v60 = vpack.c.bf16 %v1437_v59, %v1436_v58  ;;  %1570 = vrot.lane.b32.xlu1 %v1338_v56, %s3140_s23  ;;  %1572 = vrot.lane.b32.xlu0 %v1339_v57, %s3140_s23  ;;  %s2048_s23 = sshll.u32 %s556_s3, 4  ;;  %s3054_s23 = int_to_ptr.vmem [resolvable:$true] %s2048_s23 }
 0x61c   : > { %2334 = vmatprep.subr.bf16.mxu0 %v2564_v15  ;;  %s2502_s28 = scalar_lea.vmem %s3054_s23, 256  ;;  %p2509_p0 = scmp.lt.s32.totalorder %s3054_s23, %s2507_s5 }
 0x61d   : > { %2329 = vmatmul.mubr.msk.bf16.gmra.mxu1 %vm732_vm3, %v1445_v60  ;;  %p2503_p11 = scmp.ne.s32.totalorder %s3054_s23, %s2502_s28 }
 0x61e   : > { %2372 = vmatprep.mubr.msk.bf16.mxu1 %vm2565_vm1, %v2564_v15  ;;  %2335 = vmatpush3.bf16.msra.mxu0 %v2443_v53 }
 0x61f   : > { %2340 = vmatprep.subr.bf16.mxu0 %v2564_v15  ;;  %p2504_p12 = pnand %p2503_p11, %p2712_p5 }
 0x621   : > { %p2505_p13 = pneg %p2504_p12 }
 0x68d   : > { %v2943_v4 = vpop.permute.xlu1 %1570  ;;  %v2946_v7 = vpop.permute.xlu0 %1572 }
 0x6ba   : > { %v2939_v61 = vpop.f32.mrf.mxu1 }
 0x6bc   : > { %v2304_v62 = vpop.f32.mrf.mxu1 }
 0x6be   : > { %v2941_v63 = vpop.f32.mrf.mxu1 }
 0x6c0   : > { %v2305_v0 = vpop.f32.mrf.mxu1 }
 0x6c5   : > { %v2318_v1 = vpop.f32.mrf.mxu1 }
 0x6c6   : > { %v1584_v8 = vadd.f32 %v2318_v1, %v2943_v4 }
 0x6c7   : > { %v1505_v2 = vpop.f32.mrf.mxu1 }
 0x6c8   : > { %v1576_v6 = vadd.f32 %v2943_v4, %v1505_v2  ;;  %v1588_v16 = vmul.f32 0.2, %v1584_v8  ;;  %vm1586_vm10 = vcmp.gt.f32.partialorder %v1584_v8, 0.0 }
 0x6c9   : > { %v2319_v3 = vpop.f32.mrf.mxu1 }
 0x6ca   : > { %v1580_v13 = vmul.f32 0.2, %v1576_v6  ;;  %v1585_v14 = vadd.f32 %v2319_v3, %v2946_v7  ;;  %vm1578_vm3 = vcmp.gt.f32.partialorder %v1576_v6, 0.0  ;;  %v1590_v26 = vsel %vm1586_vm10, %v1584_v8, %v1588_v16 }
 0x6cb   : > { %v1508_v38 = vpop.f32.mrf.mxu1 }
 0x6cc   : > { %v1577_v10 = vadd.f32 %v2946_v7, %v1508_v38  ;;  %v1582_v23 = vsel %vm1578_vm3, %v1576_v6, %v1580_v13  ;;  %v1589_v24 = vmul.f32 0.2, %v1585_v14  ;;  %vm1587_vm13 = vcmp.gt.f32.partialorder %v1585_v14, 0.0 }
 0x6cd   : > { %v2322_v5 = vpop.f32.mrf.mxu1  ;;  %v1592_v31 = vmax.f32 %v1582_v23, %v1590_v26  ;;  %v2445_v23 = vld [vmem:[%s3113_s9] sm:$0xff]  }
 0x6ce   : > { %v1581_v18 = vmul.f32 0.2, %v1577_v10  ;;  %vm1579_vm11 = vcmp.gt.f32.partialorder %v1577_v10, 0.0  ;;  %v1604_v21 = vadd.f32 %v2322_v5, %v2943_v4  ;;  %v1591_v35 = vsel %vm1587_vm13, %v1585_v14, %v1589_v24 }
 0x6cf   : > { %v1521_v9 = vpop.f32.mrf.mxu1 }
 0x6d0   : > { %v1594_v11 = vadd.f32 %v2943_v4, %v1521_v9  ;;  %v1583_v28 = vsel %vm1579_vm11, %v1577_v10, %v1581_v18  ;;  %v1608_v32 = vmul.f32 0.2, %v1604_v21  ;;  %vm1606_vm15 = vcmp.gt.f32.partialorder %v1604_v21, 0.0 }
 0x6d1   : > { %v2323_v12 = vpop.f32.mrf.mxu1  ;;  %v1593_v39 = vmax.f32 %v1583_v28, %v1591_v35  ;;  %v2500_v35 = vld [vmem:[%s2730_s18] sm:$0xff] }
 0x6d2   : > { %v1598_v19 = vmul.f32 0.2, %v1594_v11  ;;  %vm1596_vm12 = vcmp.gt.f32.partialorder %v1594_v11, 0.0  ;;  %v1605_v33 = vadd.f32 %v2323_v12, %v2946_v7  ;;  %v1610_v45 = vsel %vm1606_vm15, %v1604_v21, %v1608_v32 }
 0x6d3   : > { %v1524_v17 = vpop.f32.mrf.mxu1 }
 0x6d4   : > { %v1595_v20 = vadd.f32 %v2946_v7, %v1524_v17  ;;  %v1600_v29 = vsel %vm1596_vm12, %v1594_v11, %v1598_v19  ;;  %v1609_v42 = vmul.f32 0.2, %v1605_v33  ;;  %vm1607_vm4 = vcmp.gt.f32.partialorder %v1605_v33, 0.0 }
 0x6d5   : > { %v2326_v22 = vpop.f32.mrf.mxu1  ;;  %v1602_v40 = vmax.f32 %v1592_v31, %v1600_v29 }
 0x6d6   : > { %v1599_v25 = vmul.f32 0.2, %v1595_v20  ;;  %vm1597_vm14 = vcmp.gt.f32.partialorder %v1595_v20, 0.0  ;;  %v1624_v43 = vadd.f32 %v2326_v22, %v2943_v4  ;;  %v1611_v55 = vsel %vm1607_vm4, %v1605_v33, %v1609_v42  ;;  %v2144_v22 = vld [vmem:[%s3141_s6] ss:$0 sm:$0xff]  ;;  %v2501_v42 = vld [vmem:[%s2730_s18 + $0x8] sm:$0xff]  ;;  %s3060_s18 = scalar_lea.hbm %s3121_s17, %s2189_s4 }
 0x6d7   : > { %v1537_v27 = vpop.f32.mrf.mxu1  ;;  %v1612_v52 = vmax.f32 %v1602_v40, %v1610_v45  ;;  %v1269_v24 = vadd.f32 %v2144_v22, %v2941_v63  ;;  %s2508_s6 = scalar_lea.vmem %s2507_s5, 512 }
 0x6d8   : > { %v1614_v30 = vadd.f32 %v2943_v4, %v1537_v27  ;;  %v1601_v36 = vsel %vm1597_vm14, %v1595_v20, %v1599_v25  ;;  %v1628_v56 = vmul.f32 0.2, %v1624_v43  ;;  %vm1626_vm6 = vcmp.gt.f32.partialorder %v1624_v43, 0.0  ;;  %p2510_p1 = scmp.lt.s32.totalorder %s2508_s6, %s2502_s28 }
 0x6d9   : > { %v2327_v34 = vpop.f32.mrf.mxu1  ;;  %v1603_v46 = vmax.f32 %v1593_v39, %v1601_v36  ;;  %v1266_v25 = vadd.f32 %v2144_v22, %v2939_v61  ;;  %v2166_v61 = vld [vmem:[%s3114_s10] ss:$0 sm:$0xff] }
 0x6da   : > { %v1618_v37 = vmul.f32 0.2, %v1614_v30  ;;  %vm1616_vm2 = vcmp.gt.f32.partialorder %v1614_v30, 0.0  ;;  %v1625_v50 = vadd.f32 %v2327_v34, %v2946_v7  ;;  %v1630_v38 = vsel %vm1626_vm6, %v1624_v43, %v1628_v56  ;;  %p2511_p2 = por %p2510_p1, %p2509_p0 }
 0x6db   : > { %v1540_v41 = vpop.f32.mrf.mxu1  ;;  %v1613_v60 = vmax.f32 %v1603_v46, %v1611_v55  ;;  %v1654_v26 = vpack.c.bf16 %v1269_v24, %v1266_v25 }
 0x6dc   : > { %v1615_v44 = vadd.f32 %v2946_v7, %v1540_v41  ;;  %v1620_v48 = vsel %vm1616_vm2, %v1614_v30, %v1618_v37  ;;  %v1629_v62 = vmul.f32 0.2, %v1625_v50  ;;  %vm1627_vm8 = vcmp.gt.f32.partialorder %v1625_v50, 0.0  ;;  %p2512_p3 = pnand %p2511_p2, %p2505_p13 }
 0x6dd   : > { %v2330_v47 = vpop.f32.mrf.mxu1  ;;  %v1622_v59 = vmax.f32 %v1612_v52, %v1620_v48 }
 0x6de   : > { %vm1617_vm5 = vcmp.gt.f32.partialorder %v1615_v44, 0.0  ;;  %v1619_v51 = vmul.f32 0.2, %v1615_v44  ;;  %v1644_v49 = vadd.f32 %v2330_v47, %v2943_v4  ;;  %v1631_v10 = vsel %vm1627_vm8, %v1625_v50, %v1629_v62 }
 0x6df   : > { %v1553_v54 = vpop.f32.mrf.mxu1  ;;  %v1632_v9 = vmax.f32 %v1622_v59, %v1630_v38 }
 0x6e0   : > { %v1621_v57 = vsel %vm1617_vm5, %v1615_v44, %v1619_v51  ;;  %v1634_v58 = vadd.f32 %v2943_v4, %v1553_v54  ;;  %v1648_v8 = vmul.f32 0.2, %v1644_v49  ;;  %vm1646_vm3 = vcmp.gt.f32.partialorder %v1644_v49, 0.0 }
 0x6e1   : > { %v2331_v53 = vpop.f32.mrf.mxu1  ;;  %v1623_v2 = vmax.f32 %v1613_v60, %v1621_v57  ;;  %v2446_v57 = vld [vmem:[%s3117_s13 + $0x8] sm:$0xff]  }
 0x6e2   : > { %vm1636_vm7 = vcmp.gt.f32.partialorder %v1634_v58, 0.0  ;;  %v1638_v0 = vmul.f32 0.2, %v1634_v58  ;;  %v1645_v1 = vadd.f32 %v2331_v53, %v2946_v7  ;;  %v1650_v17 = vsel %vm1646_vm3, %v1644_v49, %v1648_v8  ;;  %v2168_v8 = vld [vmem:[%s3116_s12] ss:$0 sm:$0xff] }
 0x6e3   : > { %v1556_v3 = vpop.f32.mrf.mxu1  ;;  %v1633_v13 = vmax.f32 %v1623_v2, %v1631_v10 }
 0x6e4   : > { %v1640_v5 = vsel %vm1636_vm7, %v1634_v58, %v1638_v0  ;;  %v1635_v6 = vadd.f32 %v2946_v7, %v1556_v3  ;;  %v1649_v11 = vmul.f32 0.2, %v1645_v1  ;;  %vm1647_vm10 = vcmp.gt.f32.partialorder %v1645_v1, 0.0  ;;  %v2444_v7 = vld [vmem:[%s3113_s9 + $0x8] sm:$0xff]   ;;  %v2447_v58 = vld [vmem:[%s3117_s13] sm:$0xff]  }
 0x6e5   : > { %v1642_v4 = vmax.f32 %v1632_v9, %v1640_v5  ;;  %v2167_v3 = vld [vmem:[%s3115_s11] ss:$0 sm:$0xff] }
 0x6e6   : > { %vm1637_vm9 = vcmp.gt.f32.partialorder %v1635_v6, 0.0  ;;  %v1639_v12 = vmul.f32 0.2, %v1635_v6  ;;  %v1651_v18 = vsel %vm1647_vm10, %v1645_v1, %v1649_v11 }
 0x6e7   : > { %v1652_v19 = vmax.f32 %v1642_v4, %v1650_v17  ;;  %v2448_v4 = vld [vmem:[%s3119_s15 + $0x38] sm:$0xff]  }
 0x6e8   : > { %v1641_v14 = vsel %vm1637_vm9, %v1635_v6, %v1639_v12  ;;  %2357 = vmatpush3.bf16.msra.mxu1 %v2448_v4  ;;  %v2452_v17 = vld [vmem:[%s3119_s15 + $0x18] sm:$0xff]  }
 0x6e9   : > { %v1643_v16 = vmax.f32 %v1633_v13, %v1641_v14  ;;  %2358 = vmatprep.subr.bf16.mxu1 %v2564_v15  ;;  %v2449_v13 = vld [vmem:[%s3119_s15 + $0x30] sm:$0xff]   ;;  %v2450_v14 = vld [vmem:[%s3119_s15 + $0x28] sm:$0xff]  }
 0x6eb   : > { %v1653_v20 = vmax.f32 %v1643_v16, %v1651_v18  ;;  %v2451_v16 = vld [vmem:[%s3119_s15 + $0x20] sm:$0xff]   ;;  %v2453_v18 = vld [vmem:[%s3119_s15 + $0x10] sm:$0xff]  }
 0x6ec   : > { %2359 = vmatpush3.bf16.msra.mxu1 %v2449_v13 }
 0x6ed   : > { %v1659_v21 = vpack.c.bf16 %v1653_v20, %v1652_v19  ;;  %2360 = vmatprep.subr.bf16.mxu1 %v2564_v15  ;;  %v2454_v19 = vld [vmem:[%s3119_s15 + $0x8] sm:$0xff]   ;;  %v2455_v20 = vld [vmem:[%s3119_s15] sm:$0xff]  }
 0x6ef   : > { %2337 = vmatmul.mubr.msk.bf16.vlgmr.msra.gmra.mxu0 %vm572_vm0, %v1659_v21 }
 0x6f0   : > { %2341 = vmatpush3.bf16.msra.mxu0 %v2444_v7  ;;  %2344 = vmatprep.mubr.msk.bf16.mxu0 %vm2565_vm1, %v2564_v15  ;;  %v2169_v7 = vld [vmem:[%s3118_s14] ss:$0 sm:$0xff] }
 0x6f1   : > { %2342 = vmatprep.subr.bf16.mxu0 %v2564_v15  ;;  %2361 = vmatpush3.bf16.msra.mxu1 %v2450_v14 }
 0x6f2   : > { %2362 = vmatprep.subr.bf16.mxu1 %v2564_v15 }
 0x6f4   : > { %2343 = vmatpush3.bf16.msra.mxu0 %v2445_v23 }
 0x6f5   : > { %2348 = vmatprep.subr.bf16.mxu0 %v2564_v15  ;;  %2363 = vmatpush3.bf16.msra.mxu1 %v2451_v16 }
 0x6f6   : > { %2364 = vmatprep.subr.bf16.mxu1 %v2564_v15 }
 0x6f7   : > { %2345 = vmatmul.mubr.msk.bf16.vlgmr.msra.gmra.mxu0 %vm572_vm0, %v1654_v26 }
 0x6f8   : > { %2352 = vmatprep.mubr.msk.bf16.mxu0 %vm2565_vm1, %v2564_v15  ;;  %2349 = vmatpush3.bf16.msra.mxu0 %v2446_v57 }
 0x6f9   : > { %2350 = vmatprep.subr.bf16.mxu0 %v2564_v15  ;;  %2365 = vmatpush3.bf16.msra.mxu1 %v2452_v17 }
 0x6fa   : > { %2366 = vmatprep.subr.bf16.mxu1 %v2564_v15 }
 0x6fc   : > { %2351 = vmatpush3.bf16.msra.mxu0 %v2447_v58 }
 0x6fd   : > { %2367 = vmatpush3.bf16.msra.mxu1 %v2453_v18 }
 0x6fe   : > { %2368 = vmatprep.subr.bf16.mxu1 %v2564_v15 }
 0x701   : > { %2369 = vmatpush3.bf16.msra.mxu1 %v2454_v19 }
 0x702   : > { %2370 = vmatprep.subr.bf16.mxu1 %v2564_v15 }
 0x705   : > { %2371 = vmatpush3.bf16.msra.mxu1 %v2455_v20 }
 0x7af   : > { %v1713_v27 = vpop.f32.mrf.mxu0 }
 0x7b1   : > { %v2338_v28 = vpop.f32.mrf.mxu0 }
 0x7b3   : > { %v1716_v29 = vpop.f32.mrf.mxu0 }
 0x7b5   : > { %v2339_v33 = vpop.f32.mrf.mxu0 }
 0x7b7   : > { %v1769_v63 = vpop.f32.mrf.mxu0 }
 0x7b8   : > { %v1770_v30 = vadd.f32 %v1769_v63, %v1713_v27 }
 0x7b9   : > { %v2346_v31 = vpop.f32.mrf.mxu0 }
 0x7ba   : > { %v1783_v32 = vadd.f32 %v2166_v61, %v1770_v30 }
 0x7bb   : > { %v1772_v34 = vpop.f32.mrf.mxu0 }
 0x7bc   : > { %v2986_v36 = vadd.f32 %v2500_v35, %v1783_v32  ;;  %v1773_v37 = vadd.f32 %v1772_v34, %v1716_v29 }
 0x7bd   : > { %v2347_v39 = vpop.f32.mrf.mxu0 }
 0x7be   : > { %v1784_v40 = vadd.f32 %v2166_v61, %v1773_v37  ;;  %v1789_v41 = vsel %vm572_vm0, %v2986_v36, 0.0 }
 0x7bf   : > { %1790 = vadd.xlane.f32.xlu1 %v1789_v41 }
 0x7c0   : > { %v2991_v43 = vadd.f32 %v2501_v42, %v1784_v40 }
 0x7c2   : > { %v1792_v44 = vsel %vm572_vm0, %v2991_v43, 0.0 }
 0x7c3   : > { %1793 = vadd.xlane.f32.xlu0 %v1792_v44 }
 0x848   : > { %v1791_v45 = vpop.xlane.xlu1 %1790 }
 0x849   : > { %v1795_v46 = vmul.f32 0.03125, %v1791_v45 }
 0x84b   : > { %v1797_v47 = vsub.f32 %v2986_v36, %v1795_v46  ;;  %v2173_v46 = vld [vmem:[%s3120_s16] ss:$0 sm:$0xff] }
 0x84c   : > { %v1794_v48 = vpop.xlane.xlu0 %1793 }
 0x84d   : > { %v1796_v50 = vmul.f32 0.03125, %v1794_v48  ;;  %v1799_v51 = vmul.f32 %v1797_v47, %v1797_v47 }
 0x84f   : > { %v1798_v52 = vsub.f32 %v2991_v43, %v1796_v50  ;;  %v1801_v54 = vsel %vm572_vm0, %v1799_v51, 0.0 }
 0x850   : > { %1802 = vadd.xlane.f32.xlu0 %v1801_v54 }
 0x851   : > { %v1800_v55 = vmul.f32 %v1798_v52, %v1798_v52 }
 0x853   : > { %v1804_v56 = vsel %vm572_vm0, %v1800_v55, 0.0 }
 0x854   : > { %1805 = vadd.xlane.f32.xlu0 %v1804_v56 }
 0x8d9   : > { %v1803_v59 = vpop.xlane.xlu0 %1802 }
 0x8da   : > { %v1807_v60 = vmul.f32 0.03125, %v1803_v59 }
 0x8dc   : > { %v1809_v49 = vadd.f32 1e-05, %v1807_v60 }
 0x8dd   : > { %v1806_v53 = vpop.xlane.xlu0 %1805 }
 0x8de   : > { %2492 = vrsqrt.f32 %v1809_v49  ;;  %v1808_v62 = vmul.f32 0.03125, %v1806_v53 }
 0x8e0   : > { %v1810_v0 = vadd.f32 1e-05, %v1808_v62 }
 0x8e2   : > { %2494 = vrsqrt.f32 %v1810_v0 }
 0x8eb   : > { %v2493_v1 = vpop.eup %2492 }
 0x8ec   : > { %v1813_v2 = vmul.f32 %v2493_v1, %v1797_v47 }
 0x8ee   : > { %v1821_v6 = vmul.f32 %v2167_v3, %v1813_v2 }
 0x8ef   : > { %v2495_v38 = vpop.eup %2494 }
 0x8f0   : > { %v1814_v5 = vmul.f32 %v2495_v38, %v1798_v52  ;;  %v1829_v10 = vadd.f32 %v2168_v8, %v1821_v6 }
 0x8f2   : > { %v1822_v9 = vmul.f32 %v2167_v3, %v1814_v5 }
 0x8f4   : > { %v1830_v11 = vadd.f32 %v2168_v8, %v1822_v9 }
 0x8f6   : > { %v1831_v12 = vpack.c.bf16 %v1830_v11, %v1829_v10 }
 0x8f8   : > { %2353 = vmatmul.mubr.msk.bf16.vlgmr.msra.gmra.mxu0 %vm572_vm0, %v1831_v12 }
 0x9b8   : > { %v1892_v21 = vpop.f32.mrf.mxu0 }
 0x9b9   : > { %v1893_v22 = vadd.f32 %v2169_v7, %v1892_v21 }
 0x9ba   : > { %v2354_v23 = vpop.f32.mrf.mxu0 }
 0x9bb   : > { %v1901_v24 = vmul.f32 0.044715, %v1893_v22  ;;  %v1899_v39 = vmul.f32 0.5, %v1893_v22 }
 0x9bc   : > { %v1895_v25 = vpop.f32.mrf.mxu0 }
 0x9bd   : > { %v1903_v26 = vmul.f32 %v1901_v24, %v1893_v22  ;;  %v1896_v27 = vadd.f32 %v2169_v7, %v1895_v25 }
 0x9be   : > { %v2355_v28 = vpop.f32.mrf.mxu0 }
 0x9bf   : > { %v1905_v29 = vmul.f32 %v1903_v26, %v1893_v22  ;;  %v1902_v33 = vmul.f32 0.044715, %v1896_v27  ;;  %v1900_v40 = vmul.f32 0.5, %v1896_v27 }
 0x9c1   : > { %v1907_v63 = vadd.f32 %v1905_v29, %v1893_v22  ;;  %v1904_v61 = vmul.f32 %v1902_v33, %v1896_v27 }
 0x9c3   : > { %v1909_v30 = vmul.f32 0.7978846, %v1907_v63  ;;  %v1906_v15 = vmul.f32 %v1904_v61, %v1896_v27 }
 0x9c5   : > { %2496 = vtanh.f32 %v1909_v30  ;;  %v1908_v31 = vadd.f32 %v1906_v15, %v1896_v27 }
 0x9c7   : > { %v1910_v32 = vmul.f32 0.7978846, %v1908_v31 }
 0x9c9   : > { %2498 = vtanh.f32 %v1910_v32 }
 0x9d2   : > { %v2497_v34 = vpop.eup %2496 }
 0x9d3   : > { %v1913_v35 = vadd.f32 1.0, %v2497_v34 }
 0x9d5   : > { %v1915_v42 = vmul.f32 %v1913_v35, %v1899_v39 }
 0x9d6   : > { %v2499_v37 = vpop.eup %2498 }
 0x9d7   : > { %v1914_v41 = vadd.f32 1.0, %v2499_v37 }
 0x9d9   : > { %v1916_v44 = vmul.f32 %v1914_v41, %v1900_v40 }
 0x9db   : > { %v1917_v45 = vpack.c.bf16 %v1916_v44, %v1915_v42 }
 0x9dd   : > { %2373 = vmatmul.mubr.bf16.vlgmr.msra.gmra.mxu1 %v1917_v45 }
 0xa9d   : > { %v2023_v47 = vpop.f32.mrf.mxu1 }
 0xa9e   : > { %v2024_v48 = vadd.f32 %v2173_v46, %v2023_v47 }
 0xa9f   : > { %v2374_v50 = vpop.f32.mrf.mxu1 }
 0xaa0   : > { %v2030_v51 = vadd.f32 %v2024_v48, %v2986_v36 }
 0xaa1   : > { %v2026_v52 = vpop.f32.mrf.mxu1 }
 0xaa2   : > { %2032 = vst.msk [vmem:[%s556_s3] sm:$0xff] %vm572_vm0, %v2030_v51  ;;  %v2027_v54 = vadd.f32 %v2173_v46, %v2026_v52 }
 0xaa3   : > { %v2375_v55 = vpop.f32.mrf.mxu1 }
 0xaa4   : > { %v2031_v56 = vadd.f32 %v2027_v54, %v2991_v43 }
 0xaa6   : > { %2033 = vst.msk [vmem:[%s556_s3 + $0x8] sm:$0xff] %vm572_vm0, %v2031_v56 }
 0xaa7   : > { %2515 = shalt.err (!%p2512_p3)
}
 0xaa8   : > { %s2516_s30 = scalar_lea.hbm %s3060_s18, 256  ;;  %s2520_s22 = scalar_lea.hbm %s3121_s17, 512 }
 0xaa9   : > { %p2517_p4 = scmp.ne.s32.totalorder %s3060_s18, %s2516_s30  ;;  %p2521_p9 = scmp.lt.s32.totalorder %s3060_s18, %s3121_s17 }
 0xaaa   : > { %p2522_p10 = scmp.lt.s32.totalorder %s2520_s22, %s2516_s30 }
 0xaab   : > { %p2518_p7 = pnand %p2517_p4, %p2712_p5 }
 0xaac   : > { %p2523_p11 = por %p2522_p10, %p2521_p9 }
 0xaad   : > { %p2519_p8 = pneg %p2518_p7 }
 0xaaf   : > { %p2524_p12 = pnand %p2523_p11, %p2519_p8 }
 0xab1   : > { %2527 = shalt.err (!%p2524_p12)
}
 0xab2   : > { %s2583_s5 = smov 128   ;;  %s3142_s6 = smov 8  }
 0xab3   : > { %2376 = dma.vmem_to_hbm [thread:$0]  (%p2712_p5), %s3054_s23, 256, %s3060_s18, %s3063_s21, %s2583_s5, %s2583_s5, %s3142_s6  }
 0xab4 PF: > { %p2382_p13 = scmp.ge.s32.totalorder %s2562_s27, 2  ;;  %s2063_s28 = sand.u32 1, %s2550_s24  }
 0xab5   : > { %s2064_s30 = scalar_lea.sflag [#allocation4], %s2063_s28 }
 0xab6   : > { %p2379_p0 = pnand %p2382_p13, %p2716_p6 }
 0xab8   : > { %p2380_p1 = pneg %p2379_p0 }
 0xaba   : > { %2545 = dma.done.wait (%p2380_p1), %s2064_s30, 256  }
 0xabb   : > { %2547 = vsyncadd (%p2380_p1), %s2064_s30, 4294967040  ;;  %p27_p2 = scmp.ge.s32.totalorder %s2699_s0, 4   ;;  %s3143_s24 = smov %s2554_s25 }
 0xabc   : > { %s3144_s25 = smov %s2558_s26  ;;  %s3145_s26 = smov %s2710_s19 }
 0xabd   : > { %s3146_s27 = smov %s2699_s0  ;;  %29 = sbr.rel (!%p27_p2) target bundleno = 11 (0xb), region = 126 }
 0xac2   :  { %2069 = vsyncpa [#allocation4], 1 }
 0xac3   :  { %2071 = vsyncpa [#allocation4 + $0x1], 1 }

</bundles_post_ra>
